<compile_context>
chip_gen: v6e
topology: v6e:2x2x1
jax: 0.10.0
libtpu: 0.0.40
codegen_flags: <defaults>
</compile_context>

<pallas_src>
import functools

import jax
import jax.numpy as jnp
import numpy as np
from jax.experimental import pallas as pl
from jax.experimental.pallas import tpu as pltpu

KERNEL_SIZE = 7
PAD = 3      # "same" padding for kernel_size 7 (matches the PyTorch module)
LANE = 128


def _shift_minor(x, offset):
    """result[..., i] = x[..., (i + offset) mod n] for a static integer offset."""
    n = x.shape[-1]
    d = offset % n
    if d == 0:
        return x
    if n % LANE == 0:
        # Lane-aligned logical width: XLU rotate (separate VLIW slot).
        return pltpu.roll(x, shift=n - d, axis=x.ndim - 1)
    # Fallback (not reached: the wrapper pads the lane axis to a multiple of 128).
    return jnp.concatenate([x[..., d:], x[..., :d]], axis=-1)


def _spatial_attention_kernel(w_ref, rowm_ref, colm_ref, x_ref, o_ref,
                              sum_ref, max_ref, *, C, W, ct_size):
    # w_ref    : SMEM (2*K*K,) f32        flattened conv1 weight (1, 2, K, K)
    # rowm_ref : VMEM (K, HWp) f32        row border masks (one per ky)
    # colm_ref : VMEM (K, HWp) f32        column border masks (one per kx)
    # x_ref    : VMEM (bb, ct, HWp)       one (batch-block, channel-tile) slab
    # o_ref    : VMEM (bb, HWp)           lane-dense attention map output
    # sum_ref  : VMEM (bb, HWp) f32       running channel sum
    # max_ref  : VMEM (bb, HWp) f32       running channel max
    K = KERNEL_SIZE
    ct = pl.program_id(1)
    nct = pl.num_programs(1)
    c_rem = C % ct_size                              # static (trace-time)

    # ---- init accumulators on the first channel tile -----------------------
    @pl.when(ct == 0)
    def _init():
        sum_ref[...] = jnp.zeros(sum_ref.shape, jnp.float32)
        max_ref[...] = jnp.full(max_ref.shape, -jnp.inf, jnp.float32)

    # ---- channel-tiled running sum / running max ----------------------------
    def _accumulate(n_valid):
        if n_valid == ct_size:
            x = x_ref[...].astype(jnp.float32)                       # (bb, ct, HWp)
        else:
            x = x_ref[:, pl.ds(0, n_valid), :].astype(jnp.float32)   # ragged tail
        sum_ref[...] = sum_ref[...] + jnp.sum(x, axis=1)
        max_ref[...] = jnp.maximum(max_ref[...], jnp.max(x, axis=1))

    if c_rem == 0:
        _accumulate(ct_size)                 # hot path: no masking, no selects
    else:
        @pl.when(ct < nct - 1)
        def _full_tile():
            _accumulate(ct_size)

        @pl.when(ct == nct - 1)
        def _partial_tile():
            _accumulate(c_rem)               # only the ragged last tile pays

    # ---- finalize on the last channel tile: 7x7 conv + sigmoid --------------
    @pl.when(ct == nct - 1)
    def _finalize():
        avg = sum_ref[...] * jnp.float32(1.0 / C)        # (bb, HWp)
        mx = max_ref[...]                                # (bb, HWp)
        wv = [w_ref[j] for j in range(2 * K * K)]        # hoisted scalar reads
        rms = [rowm_ref[pl.ds(k, 1), :] for k in range(K)]   # hoisted (1, HWp)
        cms = [colm_ref[pl.ds(k, 1), :] for k in range(K)]   # hoisted (1, HWp)
        acc = None
        for ky in range(K):
            dy = ky - PAD
            racc = None
            for kx in range(K):
                dx = kx - PAD
                # Combine both input channels before the shift: one roll/tap.
                comb = wv[ky * K + kx] * avg + wv[K * K + ky * K + kx] * mx
                term = cms[kx] * _shift_minor(comb, dy * W + dx)
                racc = term if racc is None else racc + term
            rterm = rms[ky] * racc
            acc = rterm if acc is None else acc + rterm
        o_ref[...] = jax.nn.sigmoid(acc).astype(o_ref.dtype)


def _vmem_capacity_bytes():
    try:
        return int(pltpu.get_tpu_info().vmem_capacity_bytes)
    except Exception:
        return 64 * 1024 * 1024          # conservative (v7x-sized) fallback


def _pick_c_tile(C, hwp, bb, itemsize, sublane, budget_bytes):
    """Largest channel tile (sublane-granular, or the full C) whose input block
    fits the per-buffer VMEM budget; prefers exact divisors of C so the
    streaming path never needs ragged-tile handling."""
    ct = budget_bytes // max(1, bb * hwp * itemsize)
    ct = max(sublane, (ct // sublane) * sublane)
    if ct >= C:
        return C
    cand = ct
    while cand >= sublane and cand * 2 >= ct:    # don't shrink by more than 2x
        if C % cand == 0:
            return int(cand)
        cand -= sublane
    return int(ct)


def spatial_attention(x, weight, *, c_tile=None, b_block=None):
    """x: (B, C, H, W); weight: (1, 2, K, K). Returns (B, 1, H, W)."""
    B, C, H, W = x.shape
    K = KERNEL_SIZE
    assert weight.shape == (1, 2, K, K), weight.shape
    HW = H * W
    HWp = ((HW + LANE - 1) // LANE) * LANE       # lane-pad: all shifts use roll

    x_flat = x.reshape(B, C, HW)
    if HWp != HW:
        x_flat = jnp.pad(x_flat, ((0, 0), (0, 0), (0, HWp - HW)))
    w_flat = weight.reshape(-1).astype(jnp.float32)

    # Zero-padding border masks per kernel row / column offset; zero at padded
    # lanes so they never contribute to in-image outputs.
    idx = np.arange(HWp)
    rows, cols, in_img = idx // W, idx % W, idx < HW
    row_masks = jnp.asarray(np.stack(
        [((rows + (k - PAD) >= 0) & (rows + (k - PAD) < H) & in_img)
         for k in range(K)]).astype(np.float32))
    col_masks = jnp.asarray(np.stack(
        [((cols + (k - PAD) >= 0) & (cols + (k - PAD) < W) & in_img)
         for k in range(K)]).astype(np.float32))

    itemsize = jnp.dtype(x.dtype).itemsize
    sublane = max(8, 32 // itemsize)             # 8 f32 / 16 bf16 / 32 int8,fp8

    # Batch block: a multiple of 8 (or the full B) keeps the (bb, HWp) output
    # BlockSpec (8,128)-legal; B > 8 also gives >=2 steps on the "parallel"
    # batch axis so both v7x TensorCores get work.  (For B <= 8 on v7x the
    # batch axis collapses to one step; splitting HWp would be the next step.)
    bb = min(int(b_block), B) if b_block is not None else (8 if B > 8 else B)
    if bb < B and bb % 8 != 0:
        bb = min(B, max(8, (bb // 8) * 8))

    cap = _vmem_capacity_bytes()
    per_buf_budget = (16 << 20) if cap <= (64 << 20) else (32 << 20)
    if c_tile is not None:
        ct = min(int(c_tile), C)
        if ct < C:
            ct = max(sublane, (ct // sublane) * sublane)
    else:
        ct = _pick_c_tile(C, HWp, bb, itemsize, sublane, per_buf_budget)

    grid = (pl.cdiv(B, bb), pl.cdiv(C, ct))

    vmem_needed = (2 * bb * ct * HWp * itemsize      # x double-buffer
                   + 2 * bb * HWp * itemsize         # output double-buffer
                   + 2 * bb * HWp * 4                # sum/max accumulators
                   + 2 * 2 * K * HWp * 4)            # mask double-buffers
    vmem_limit = int(min(max(vmem_needed + (8 << 20), 32 << 20),
                         int(cap * 0.9)))

    kernel = functools.partial(_spatial_attention_kernel, C=C, W=W, ct_size=ct)

    out_flat = pl.pallas_call(
        kernel,
        grid=grid,
        in_specs=[
            pl.BlockSpec(memory_space=pltpu.MemorySpace.SMEM),      # weights
            pl.BlockSpec((K, HWp), lambda b, c: (0, 0)),            # row masks
            pl.BlockSpec((K, HWp), lambda b, c: (0, 0)),            # col masks
            pl.BlockSpec((bb, ct, HWp), lambda b, c: (b, c, 0)),    # x tile
        ],
        out_specs=pl.BlockSpec((bb, HWp), lambda b, c: (b, 0)),
        out_shape=jax.ShapeDtypeStruct((B, HWp), x.dtype),
        scratch_shapes=[
            pltpu.VMEM((bb, HWp), jnp.float32),    # running channel sum
            pltpu.VMEM((bb, HWp), jnp.float32),    # running channel max
        ],
        compiler_params=pltpu.CompilerParams(
            dimension_semantics=("parallel", "arbitrary"),
            vmem_limit_bytes=vmem_limit),
    )(w_flat, row_masks, col_masks, x_flat)

    return out_flat[:, :HW].reshape(B, 1, H, W)


def _reference(x, weight):
    # Pure-JAX reference mirroring the PyTorch forward.
    avg_out = jnp.mean(x, axis=1, keepdims=True)
    max_out = jnp.max(x, axis=1, keepdims=True)
    feat = jnp.concatenate([avg_out, max_out], axis=1)
    y = jax.lax.conv_general_dilated(
        feat, weight, window_strides=(1, 1),
        padding=((PAD, PAD), (PAD, PAD)),
        dimension_numbers=("NCHW", "OIHW", "NCHW"))
    return jax.nn.sigmoid(y)


if __name__ == "__main__":
    key = jax.random.PRNGKey(0)
    key_x1, key_x2, key_w = jax.random.split(key, 3)

    # Deterministic synthetic conv1 weight: Conv2d(2, 1, 7, bias=False) -> (1, 2, 7, 7)
    weight = 0.1 * jax.random.normal(
        key_w, (1, 2, KERNEL_SIZE, KERNEL_SIZE), dtype=jnp.float32)

    # Case 1: lane-aligned spatial size (H*W % 128 == 0).
    B, C, H, W = 2, 4, 16, 16
    x1 = jax.random.normal(key_x1, (B, C, H, W), dtype=jnp.float32)
    out1 = jax.block_until_ready(spatial_attention(x1, weight))
    ref1 = jax.block_until_ready(_reference(x1, weight))
    assert out1.shape == (B, 1, H, W), out1.shape
    err1 = float(jnp.max(jnp.abs(out1 - ref1)))
    assert err1 < 5e-5, err1

    # Case 2: H*W % 128 != 0 (lane-padding path) + ragged channel tiling.
    B2, C2, H2, W2 = 2, 12, 14, 14
    x2 = jax.random.normal(key_x2, (B2, C2, H2, W2), dtype=jnp.float32)
    out2 = jax.block_until_ready(spatial_attention(x2, weight, c_tile=8))
    ref2 = jax.block_until_ready(_reference(x2, weight))
    assert out2.shape == (B2, 1, H2, W2), out2.shape
    err2 = float(jnp.max(jnp.abs(out2 - ref2)))
    assert err2 < 5e-5, err2

    print("KERNEL_OK")
</pallas_src>

<mosaic_0001>
module attributes {stable_mosaic.version = 11 : i64} {
  func.func @_spatial_attention_kernel(%arg0: i32, %arg1: i32, %arg2: memref<98xf32, #tpu.memory_space<smem>>, %arg3: memref<7x256xf32, #tpu.memory_space<vmem>>, %arg4: memref<7x256xf32, #tpu.memory_space<vmem>>, %arg5: memref<2x4x256xf32, #tpu.memory_space<vmem>>, %arg6: memref<2x256xf32, #tpu.memory_space<vmem>>, %arg7: memref<2x256xf32, #tpu.memory_space<vmem>>, %arg8: memref<2x256xf32, #tpu.memory_space<vmem>>) attributes {dimension_semantics = [#tpu.dimension_semantics<parallel>, #tpu.dimension_semantics<arbitrary>], iteration_bounds = array<i64: 1, 1>, scalar_prefetch = 0 : i64, scratch_operands = 2 : i64, tpu.core_type = #tpu.core_type<tc>, window_params = [{transform_indices = @transform_0, window_bounds = array<i64: 98>}, {pipeline_mode = #tpu.pipeline_mode<synchronous>, transform_indices = @transform_1, window_bounds = array<i64: 7, 256>}, {pipeline_mode = #tpu.pipeline_mode<synchronous>, transform_indices = @transform_2, window_bounds = array<i64: 7, 256>}, {transform_indices = @transform_3, window_bounds = array<i64: 2, 4, 256>}, {transform_indices = @transform_4, window_bounds = array<i64: 2, 256>}]} {
    %c0_i32 = arith.constant 0 : i32
    %0 = arith.cmpi eq, %arg1, %c0_i32 : i32
    %1 = arith.extui %0 : i1 to i32
    %c0_i32_0 = arith.constant 0 : i32
    %2 = arith.cmpi ne, %1, %c0_i32_0 : i32
    scf.if %2 {
      %cst_14 = arith.constant 0.000000e+00 : f32
      %15 = vector.broadcast %cst_14 : f32 to vector<2x256xf32>
      %c0_15 = arith.constant 0 : index
      %c0_16 = arith.constant 0 : index
      %16 = vector.load %arg7[%c0_15, %c0_16] : memref<2x256xf32, #tpu.memory_space<vmem>>, vector<2x256xf32>
      tpu.vector_store %arg7[%c0_15, %c0_16], %15 {strides = array<i32>} : memref<2x256xf32, #tpu.memory_space<vmem>>, vector<2x256xf32>,
      %cst_17 = arith.constant 0xFF800000 : f32
      %17 = vector.broadcast %cst_17 : f32 to vector<2x256xf32>
      %c0_18 = arith.constant 0 : index
      %c0_19 = arith.constant 0 : index
      %18 = vector.load %arg8[%c0_18, %c0_19] : memref<2x256xf32, #tpu.memory_space<vmem>>, vector<2x256xf32>
      tpu.vector_store %arg8[%c0_18, %c0_19], %17 {strides = array<i32>} : memref<2x256xf32, #tpu.memory_space<vmem>>, vector<2x256xf32>,
    } else {
    }
    %c0 = arith.constant 0 : index
    %c0_1 = arith.constant 0 : index
    %c0_2 = arith.constant 0 : index
    %3 = vector.load %arg5[%c0, %c0_1, %c0_2] : memref<2x4x256xf32, #tpu.memory_space<vmem>>, vector<2x4x256xf32>
    %c0_3 = arith.constant 0 : index
    %c0_4 = arith.constant 0 : index
    %4 = vector.load %arg7[%c0_3, %c0_4] : memref<2x256xf32, #tpu.memory_space<vmem>>, vector<2x256xf32>
    %cst = arith.constant dense<0.000000e+00> : vector<2x256xf32>
    %5 = vector.multi_reduction <add>, %3, %cst [1] : vector<2x4x256xf32> to vector<2x256xf32>
    %6 = arith.addf %4, %5 : vector<2x256xf32>
    %c0_5 = arith.constant 0 : index
    %c0_6 = arith.constant 0 : index
    %7 = vector.load %arg7[%c0_5, %c0_6] : memref<2x256xf32, #tpu.memory_space<vmem>>, vector<2x256xf32>
    tpu.vector_store %arg7[%c0_5, %c0_6], %6 {strides = array<i32>} : memref<2x256xf32, #tpu.memory_space<vmem>>, vector<2x256xf32>,
    %c0_7 = arith.constant 0 : index
    %c0_8 = arith.constant 0 : index
    %8 = vector.load %arg8[%c0_7, %c0_8] : memref<2x256xf32, #tpu.memory_space<vmem>>, vector<2x256xf32>
    %cst_9 = arith.constant dense<0xFF800000> : vector<2x256xf32>
    %9 = vector.multi_reduction <maximumf>, %3, %cst_9 [1] : vector<2x4x256xf32> to vector<2x256xf32>
    %10 = arith.maximumf %8, %9 : vector<2x256xf32>
    %c0_10 = arith.constant 0 : index
    %c0_11 = arith.constant 0 : index
    %11 = vector.load %arg8[%c0_10, %c0_11] : memref<2x256xf32, #tpu.memory_space<vmem>>, vector<2x256xf32>
    tpu.vector_store %arg8[%c0_10, %c0_11], %10 {strides = array<i32>} : memref<2x256xf32, #tpu.memory_space<vmem>>, vector<2x256xf32>,
    %c0_i32_12 = arith.constant 0 : i32
    %12 = arith.cmpi eq, %arg1, %c0_i32_12 : i32
    %13 = arith.extui %12 : i1 to i32
    %c0_i32_13 = arith.constant 0 : i32
    %14 = arith.cmpi ne, %13, %c0_i32_13 : i32
    scf.if %14 {
      %c0_14 = arith.constant 0 : index
      %c0_15 = arith.constant 0 : index
      %15 = vector.load %arg7[%c0_14, %c0_15] : memref<2x256xf32, #tpu.memory_space<vmem>>, vector<2x256xf32>
      %cst_16 = arith.constant 2.500000e-01 : f32
      %16 = vector.broadcast %cst_16 : f32 to vector<2x256xf32>
      %17 = arith.mulf %15, %16 : vector<2x256xf32>
      %c0_17 = arith.constant 0 : index
      %c0_18 = arith.constant 0 : index
      %18 = vector.load %arg8[%c0_17, %c0_18] : memref<2x256xf32, #tpu.memory_space<vmem>>, vector<2x256xf32>
      %c0_19 = arith.constant 0 : index
      %19 = memref.load %arg2[%c0_19] : memref<98xf32, #tpu.memory_space<smem>>
      %c1 = arith.constant 1 : index
      %20 = memref.load %arg2[%c1] : memref<98xf32, #tpu.memory_space<smem>>
      %c2 = arith.constant 2 : index
      %21 = memref.load %arg2[%c2] : memref<98xf32, #tpu.memory_space<smem>>
      %c3 = arith.constant 3 : index
      %22 = memref.load %arg2[%c3] : memref<98xf32, #tpu.memory_space<smem>>
      %c4 = arith.constant 4 : index
      %23 = memref.load %arg2[%c4] : memref<98xf32, #tpu.memory_space<smem>>
      %c5 = arith.constant 5 : index
      %24 = memref.load %arg2[%c5] : memref<98xf32, #tpu.memory_space<smem>>
      %c6 = arith.constant 6 : index
      %25 = memref.load %arg2[%c6] : memref<98xf32, #tpu.memory_space<smem>>
      %c7 = arith.constant 7 : index
      %26 = memref.load %arg2[%c7] : memref<98xf32, #tpu.memory_space<smem>>
      %c8 = arith.constant 8 : index
      %27 = memref.load %arg2[%c8] : memref<98xf32, #tpu.memory_space<smem>>
      %c9 = arith.constant 9 : index
      %28 = memref.load %arg2[%c9] : memref<98xf32, #tpu.memory_space<smem>>
      %c10 = arith.constant 10 : index
      %29 = memref.load %arg2[%c10] : memref<98xf32, #tpu.memory_space<smem>>
      %c11 = arith.constant 11 : index
      %30 = memref.load %arg2[%c11] : memref<98xf32, #tpu.memory_space<smem>>
      %c12 = arith.constant 12 : index
      %31 = memref.load %arg2[%c12] : memref<98xf32, #tpu.memory_space<smem>>
      %c13 = arith.constant 13 : index
      %32 = memref.load %arg2[%c13] : memref<98xf32, #tpu.memory_space<smem>>
      %c14 = arith.constant 14 : index
      %33 = memref.load %arg2[%c14] : memref<98xf32, #tpu.memory_space<smem>>
      %c15 = arith.constant 15 : index
      %34 = memref.load %arg2[%c15] : memref<98xf32, #tpu.memory_space<smem>>
      %c16 = arith.constant 16 : index
      %35 = memref.load %arg2[%c16] : memref<98xf32, #tpu.memory_space<smem>>
      %c17 = arith.constant 17 : index
      %36 = memref.load %arg2[%c17] : memref<98xf32, #tpu.memory_space<smem>>
      %c18 = arith.constant 18 : index
      %37 = memref.load %arg2[%c18] : memref<98xf32, #tpu.memory_space<smem>>
      %c19 = arith.constant 19 : index
      %38 = memref.load %arg2[%c19] : memref<98xf32, #tpu.memory_space<smem>>
      %c20 = arith.constant 20 : index
      %39 = memref.load %arg2[%c20] : memref<98xf32, #tpu.memory_space<smem>>
      %c21 = arith.constant 21 : index
      %40 = memref.load %arg2[%c21] : memref<98xf32, #tpu.memory_space<smem>>
      %c22 = arith.constant 22 : index
      %41 = memref.load %arg2[%c22] : memref<98xf32, #tpu.memory_space<smem>>
      %c23 = arith.constant 23 : index
      %42 = memref.load %arg2[%c23] : memref<98xf32, #tpu.memory_space<smem>>
      %c24 = arith.constant 24 : index
      %43 = memref.load %arg2[%c24] : memref<98xf32, #tpu.memory_space<smem>>
      %c25 = arith.constant 25 : index
      %44 = memref.load %arg2[%c25] : memref<98xf32, #tpu.memory_space<smem>>
      %c26 = arith.constant 26 : index
      %45 = memref.load %arg2[%c26] : memref<98xf32, #tpu.memory_space<smem>>
      %c27 = arith.constant 27 : index
      %46 = memref.load %arg2[%c27] : memref<98xf32, #tpu.memory_space<smem>>
      %c28 = arith.constant 28 : index
      %47 = memref.load %arg2[%c28] : memref<98xf32, #tpu.memory_space<smem>>
      %c29 = arith.constant 29 : index
      %48 = memref.load %arg2[%c29] : memref<98xf32, #tpu.memory_space<smem>>
      %c30 = arith.constant 30 : index
      %49 = memref.load %arg2[%c30] : memref<98xf32, #tpu.memory_space<smem>>
      %c31 = arith.constant 31 : index
      %50 = memref.load %arg2[%c31] : memref<98xf32, #tpu.memory_space<smem>>
      %c32 = arith.constant 32 : index
      %51 = memref.load %arg2[%c32] : memref<98xf32, #tpu.memory_space<smem>>
      %c33 = arith.constant 33 : index
      %52 = memref.load %arg2[%c33] : memref<98xf32, #tpu.memory_space<smem>>
      %c34 = arith.constant 34 : index
      %53 = memref.load %arg2[%c34] : memref<98xf32, #tpu.memory_space<smem>>
      %c35 = arith.constant 35 : index
      %54 = memref.load %arg2[%c35] : memref<98xf32, #tpu.memory_space<smem>>
      %c36 = arith.constant 36 : index
      %55 = memref.load %arg2[%c36] : memref<98xf32, #tpu.memory_space<smem>>
      %c37 = arith.constant 37 : index
      %56 = memref.load %arg2[%c37] : memref<98xf32, #tpu.memory_space<smem>>
      %c38 = arith.constant 38 : index
      %57 = memref.load %arg2[%c38] : memref<98xf32, #tpu.memory_space<smem>>
      %c39 = arith.constant 39 : index
      %58 = memref.load %arg2[%c39] : memref<98xf32, #tpu.memory_space<smem>>
      %c40 = arith.constant 40 : index
      %59 = memref.load %arg2[%c40] : memref<98xf32, #tpu.memory_space<smem>>
      %c41 = arith.constant 41 : index
      %60 = memref.load %arg2[%c41] : memref<98xf32, #tpu.memory_space<smem>>
      %c42 = arith.constant 42 : index
      %61 = memref.load %arg2[%c42] : memref<98xf32, #tpu.memory_space<smem>>
      %c43 = arith.constant 43 : index
      %62 = memref.load %arg2[%c43] : memref<98xf32, #tpu.memory_space<smem>>
      %c44 = arith.constant 44 : index
      %63 = memref.load %arg2[%c44] : memref<98xf32, #tpu.memory_space<smem>>
      %c45 = arith.constant 45 : index
      %64 = memref.load %arg2[%c45] : memref<98xf32, #tpu.memory_space<smem>>
      %c46 = arith.constant 46 : index
      %65 = memref.load %arg2[%c46] : memref<98xf32, #tpu.memory_space<smem>>
      %c47 = arith.constant 47 : index
      %66 = memref.load %arg2[%c47] : memref<98xf32, #tpu.memory_space<smem>>
      %c48 = arith.constant 48 : index
      %67 = memref.load %arg2[%c48] : memref<98xf32, #tpu.memory_space<smem>>
      %c49 = arith.constant 49 : index
      %68 = memref.load %arg2[%c49] : memref<98xf32, #tpu.memory_space<smem>>
      %c50 = arith.constant 50 : index
      %69 = memref.load %arg2[%c50] : memref<98xf32, #tpu.memory_space<smem>>
      %c51 = arith.constant 51 : index
      %70 = memref.load %arg2[%c51] : memref<98xf32, #tpu.memory_space<smem>>
      %c52 = arith.constant 52 : index
      %71 = memref.load %arg2[%c52] : memref<98xf32, #tpu.memory_space<smem>>
      %c53 = arith.constant 53 : index
      %72 = memref.load %arg2[%c53] : memref<98xf32, #tpu.memory_space<smem>>
      %c54 = arith.constant 54 : index
      %73 = memref.load %arg2[%c54] : memref<98xf32, #tpu.memory_space<smem>>
      %c55 = arith.constant 55 : index
      %74 = memref.load %arg2[%c55] : memref<98xf32, #tpu.memory_space<smem>>
      %c56 = arith.constant 56 : index
      %75 = memref.load %arg2[%c56] : memref<98xf32, #tpu.memory_space<smem>>
      %c57 = arith.constant 57 : index
      %76 = memref.load %arg2[%c57] : memref<98xf32, #tpu.memory_space<smem>>
      %c58 = arith.constant 58 : index
      %77 = memref.load %arg2[%c58] : memref<98xf32, #tpu.memory_space<smem>>
      %c59 = arith.constant 59 : index
      %78 = memref.load %arg2[%c59] : memref<98xf32, #tpu.memory_space<smem>>
      %c60 = arith.constant 60 : index
      %79 = memref.load %arg2[%c60] : memref<98xf32, #tpu.memory_space<smem>>
      %c61 = arith.constant 61 : index
      %80 = memref.load %arg2[%c61] : memref<98xf32, #tpu.memory_space<smem>>
      %c62 = arith.constant 62 : index
      %81 = memref.load %arg2[%c62] : memref<98xf32, #tpu.memory_space<smem>>
      %c63 = arith.constant 63 : index
      %82 = memref.load %arg2[%c63] : memref<98xf32, #tpu.memory_space<smem>>
      %c64 = arith.constant 64 : index
      %83 = memref.load %arg2[%c64] : memref<98xf32, #tpu.memory_space<smem>>
      %c65 = arith.constant 65 : index
      %84 = memref.load %arg2[%c65] : memref<98xf32, #tpu.memory_space<smem>>
      %c66 = arith.constant 66 : index
      %85 = memref.load %arg2[%c66] : memref<98xf32, #tpu.memory_space<smem>>
      %c67 = arith.constant 67 : index
      %86 = memref.load %arg2[%c67] : memref<98xf32, #tpu.memory_space<smem>>
      %c68 = arith.constant 68 : index
      %87 = memref.load %arg2[%c68] : memref<98xf32, #tpu.memory_space<smem>>
      %c69 = arith.constant 69 : index
      %88 = memref.load %arg2[%c69] : memref<98xf32, #tpu.memory_space<smem>>
      %c70 = arith.constant 70 : index
      %89 = memref.load %arg2[%c70] : memref<98xf32, #tpu.memory_space<smem>>
      %c71 = arith.constant 71 : index
      %90 = memref.load %arg2[%c71] : memref<98xf32, #tpu.memory_space<smem>>
      %c72 = arith.constant 72 : index
      %91 = memref.load %arg2[%c72] : memref<98xf32, #tpu.memory_space<smem>>
      %c73 = arith.constant 73 : index
      %92 = memref.load %arg2[%c73] : memref<98xf32, #tpu.memory_space<smem>>
      %c74 = arith.constant 74 : index
      %93 = memref.load %arg2[%c74] : memref<98xf32, #tpu.memory_space<smem>>
      %c75 = arith.constant 75 : index
      %94 = memref.load %arg2[%c75] : memref<98xf32, #tpu.memory_space<smem>>
      %c76 = arith.constant 76 : index
      %95 = memref.load %arg2[%c76] : memref<98xf32, #tpu.memory_space<smem>>
      %c77 = arith.constant 77 : index
      %96 = memref.load %arg2[%c77] : memref<98xf32, #tpu.memory_space<smem>>
      %c78 = arith.constant 78 : index
      %97 = memref.load %arg2[%c78] : memref<98xf32, #tpu.memory_space<smem>>
      %c79 = arith.constant 79 : index
      %98 = memref.load %arg2[%c79] : memref<98xf32, #tpu.memory_space<smem>>
      %c80 = arith.constant 80 : index
      %99 = memref.load %arg2[%c80] : memref<98xf32, #tpu.memory_space<smem>>
      %c81 = arith.constant 81 : index
      %100 = memref.load %arg2[%c81] : memref<98xf32, #tpu.memory_space<smem>>
      %c82 = arith.constant 82 : index
      %101 = memref.load %arg2[%c82] : memref<98xf32, #tpu.memory_space<smem>>
      %c83 = arith.constant 83 : index
      %102 = memref.load %arg2[%c83] : memref<98xf32, #tpu.memory_space<smem>>
      %c84 = arith.constant 84 : index
      %103 = memref.load %arg2[%c84] : memref<98xf32, #tpu.memory_space<smem>>
      %c85 = arith.constant 85 : index
      %104 = memref.load %arg2[%c85] : memref<98xf32, #tpu.memory_space<smem>>
      %c86 = arith.constant 86 : index
      %105 = memref.load %arg2[%c86] : memref<98xf32, #tpu.memory_space<smem>>
      %c87 = arith.constant 87 : index
      %106 = memref.load %arg2[%c87] : memref<98xf32, #tpu.memory_space<smem>>
      %c88 = arith.constant 88 : index
      %107 = memref.load %arg2[%c88] : memref<98xf32, #tpu.memory_space<smem>>
      %c89 = arith.constant 89 : index
      %108 = memref.load %arg2[%c89] : memref<98xf32, #tpu.memory_space<smem>>
      %c90 = arith.constant 90 : index
      %109 = memref.load %arg2[%c90] : memref<98xf32, #tpu.memory_space<smem>>
      %c91 = arith.constant 91 : index
      %110 = memref.load %arg2[%c91] : memref<98xf32, #tpu.memory_space<smem>>
      %c92 = arith.constant 92 : index
      %111 = memref.load %arg2[%c92] : memref<98xf32, #tpu.memory_space<smem>>
      %c93 = arith.constant 93 : index
      %112 = memref.load %arg2[%c93] : memref<98xf32, #tpu.memory_space<smem>>
      %c94 = arith.constant 94 : index
      %113 = memref.load %arg2[%c94] : memref<98xf32, #tpu.memory_space<smem>>
      %c95 = arith.constant 95 : index
      %114 = memref.load %arg2[%c95] : memref<98xf32, #tpu.memory_space<smem>>
      %c96 = arith.constant 96 : index
      %115 = memref.load %arg2[%c96] : memref<98xf32, #tpu.memory_space<smem>>
      %c97 = arith.constant 97 : index
      %116 = memref.load %arg2[%c97] : memref<98xf32, #tpu.memory_space<smem>>
      %c0_20 = arith.constant 0 : index
      %c0_21 = arith.constant 0 : index
      %117 = vector.load %arg3[%c0_20, %c0_21] : memref<7x256xf32, #tpu.memory_space<vmem>>, vector<1x256xf32>
      %c1_22 = arith.constant 1 : index
      %c0_23 = arith.constant 0 : index
      %118 = vector.load %arg3[%c1_22, %c0_23] : memref<7x256xf32, #tpu.memory_space<vmem>>, vector<1x256xf32>
      %c2_24 = arith.constant 2 : index
      %c0_25 = arith.constant 0 : index
      %119 = vector.load %arg3[%c2_24, %c0_25] : memref<7x256xf32, #tpu.memory_space<vmem>>, vector<1x256xf32>
      %c3_26 = arith.constant 3 : index
      %c0_27 = arith.constant 0 : index
      %120 = vector.load %arg3[%c3_26, %c0_27] : memref<7x256xf32, #tpu.memory_space<vmem>>, vector<1x256xf32>
      %c4_28 = arith.constant 4 : index
      %c0_29 = arith.constant 0 : index
      %121 = vector.load %arg3[%c4_28, %c0_29] : memref<7x256xf32, #tpu.memory_space<vmem>>, vector<1x256xf32>
      %c5_30 = arith.constant 5 : index
      %c0_31 = arith.constant 0 : index
      %122 = vector.load %arg3[%c5_30, %c0_31] : memref<7x256xf32, #tpu.memory_space<vmem>>, vector<1x256xf32>
      %c6_32 = arith.constant 6 : index
      %c0_33 = arith.constant 0 : index
      %123 = vector.load %arg3[%c6_32, %c0_33] : memref<7x256xf32, #tpu.memory_space<vmem>>, vector<1x256xf32>
      %c0_34 = arith.constant 0 : index
      %c0_35 = arith.constant 0 : index
      %124 = vector.load %arg4[%c0_34, %c0_35] : memref<7x256xf32, #tpu.memory_space<vmem>>, vector<1x256xf32>
      %c1_36 = arith.constant 1 : index
      %c0_37 = arith.constant 0 : index
      %125 = vector.load %arg4[%c1_36, %c0_37] : memref<7x256xf32, #tpu.memory_space<vmem>>, vector<1x256xf32>
      %c2_38 = arith.constant 2 : index
      %c0_39 = arith.constant 0 : index
      %126 = vector.load %arg4[%c2_38, %c0_39] : memref<7x256xf32, #tpu.memory_space<vmem>>, vector<1x256xf32>
      %c3_40 = arith.constant 3 : index
      %c0_41 = arith.constant 0 : index
      %127 = vector.load %arg4[%c3_40, %c0_41] : memref<7x256xf32, #tpu.memory_space<vmem>>, vector<1x256xf32>
      %c4_42 = arith.constant 4 : index
      %c0_43 = arith.constant 0 : index
      %128 = vector.load %arg4[%c4_42, %c0_43] : memref<7x256xf32, #tpu.memory_space<vmem>>, vector<1x256xf32>
      %c5_44 = arith.constant 5 : index
      %c0_45 = arith.constant 0 : index
      %129 = vector.load %arg4[%c5_44, %c0_45] : memref<7x256xf32, #tpu.memory_space<vmem>>, vector<1x256xf32>
      %c6_46 = arith.constant 6 : index
      %c0_47 = arith.constant 0 : index
      %130 = vector.load %arg4[%c6_46, %c0_47] : memref<7x256xf32, #tpu.memory_space<vmem>>, vector<1x256xf32>
      %131 = vector.broadcast %19 : f32 to vector<2x256xf32>
      %132 = arith.mulf %131, %17 : vector<2x256xf32>
      %133 = vector.broadcast %68 : f32 to vector<2x256xf32>
      %134 = arith.mulf %133, %18 : vector<2x256xf32>
      %135 = arith.addf %132, %134 : vector<2x256xf32>
      %c51_i32 = arith.constant 51 : i32
      %136 = tpu.dynamic_rotate %135 by %c51_i32 dim 1 : vector<2x256xf32>, i32 -> vector<2x256xf32>
      %137 = vector.broadcast %124 : vector<1x256xf32> to vector<2x256xf32>
      %138 = arith.mulf %137, %136 : vector<2x256xf32>
      %139 = vector.broadcast %20 : f32 to vector<2x256xf32>
      %140 = arith.mulf %139, %17 : vector<2x256xf32>
      %141 = vector.broadcast %69 : f32 to vector<2x256xf32>
      %142 = arith.mulf %141, %18 : vector<2x256xf32>
      %143 = arith.addf %140, %142 : vector<2x256xf32>
      %c50_i32 = arith.constant 50 : i32
      %144 = tpu.dynamic_rotate %143 by %c50_i32 dim 1 : vector<2x256xf32>, i32 -> vector<2x256xf32>
      %145 = vector.broadcast %125 : vector<1x256xf32> to vector<2x256xf32>
      %146 = arith.mulf %145, %144 : vector<2x256xf32>
      %147 = arith.addf %138, %146 : vector<2x256xf32>
      %148 = vector.broadcast %21 : f32 to vector<2x256xf32>
      %149 = arith.mulf %148, %17 : vector<2x256xf32>
      %150 = vector.broadcast %70 : f32 to vector<2x256xf32>
      %151 = arith.mulf %150, %18 : vector<2x256xf32>
      %152 = arith.addf %149, %151 : vector<2x256xf32>
      %c49_i32 = arith.constant 49 : i32
      %153 = tpu.dynamic_rotate %152 by %c49_i32 dim 1 : vector<2x256xf32>, i32 -> vector<2x256xf32>
      %154 = vector.broadcast %126 : vector<1x256xf32> to vector<2x256xf32>
      %155 = arith.mulf %154, %153 : vector<2x256xf32>
      %156 = arith.addf %147, %155 : vector<2x256xf32>
      %157 = vector.broadcast %22 : f32 to vector<2x256xf32>
      %158 = arith.mulf %157, %17 : vector<2x256xf32>
      %159 = vector.broadcast %71 : f32 to vector<2x256xf32>
      %160 = arith.mulf %159, %18 : vector<2x256xf32>
      %161 = arith.addf %158, %160 : vector<2x256xf32>
      %c48_i32 = arith.constant 48 : i32
      %162 = tpu.dynamic_rotate %161 by %c48_i32 dim 1 : vector<2x256xf32>, i32 -> vector<2x256xf32>
      %163 = vector.broadcast %127 : vector<1x256xf32> to vector<2x256xf32>
      %164 = arith.mulf %163, %162 : vector<2x256xf32>
      %165 = arith.addf %156, %164 : vector<2x256xf32>
      %166 = vector.broadcast %23 : f32 to vector<2x256xf32>
      %167 = arith.mulf %166, %17 : vector<2x256xf32>
      %168 = vector.broadcast %72 : f32 to vector<2x256xf32>
      %169 = arith.mulf %168, %18 : vector<2x256xf32>
      %170 = arith.addf %167, %169 : vector<2x256xf32>
      %c47_i32 = arith.constant 47 : i32
      %171 = tpu.dynamic_rotate %170 by %c47_i32 dim 1 : vector<2x256xf32>, i32 -> vector<2x256xf32>
      %172 = vector.broadcast %128 : vector<1x256xf32> to vector<2x256xf32>
      %173 = arith.mulf %172, %171 : vector<2x256xf32>
      %174 = arith.addf %165, %173 : vector<2x256xf32>
      %175 = vector.broadcast %24 : f32 to vector<2x256xf32>
      %176 = arith.mulf %175, %17 : vector<2x256xf32>
      %177 = vector.broadcast %73 : f32 to vector<2x256xf32>
      %178 = arith.mulf %177, %18 : vector<2x256xf32>
      %179 = arith.addf %176, %178 : vector<2x256xf32>
      %c46_i32 = arith.constant 46 : i32
      %180 = tpu.dynamic_rotate %179 by %c46_i32 dim 1 : vector<2x256xf32>, i32 -> vector<2x256xf32>
      %181 = vector.broadcast %129 : vector<1x256xf32> to vector<2x256xf32>
      %182 = arith.mulf %181, %180 : vector<2x256xf32>
      %183 = arith.addf %174, %182 : vector<2x256xf32>
      %184 = vector.broadcast %25 : f32 to vector<2x256xf32>
      %185 = arith.mulf %184, %17 : vector<2x256xf32>
      %186 = vector.broadcast %74 : f32 to vector<2x256xf32>
      %187 = arith.mulf %186, %18 : vector<2x256xf32>
      %188 = arith.addf %185, %187 : vector<2x256xf32>
      %c45_i32 = arith.constant 45 : i32
      %189 = tpu.dynamic_rotate %188 by %c45_i32 dim 1 : vector<2x256xf32>, i32 -> vector<2x256xf32>
      %190 = vector.broadcast %130 : vector<1x256xf32> to vector<2x256xf32>
      %191 = arith.mulf %190, %189 : vector<2x256xf32>
      %192 = arith.addf %183, %191 : vector<2x256xf32>
      %193 = vector.broadcast %117 : vector<1x256xf32> to vector<2x256xf32>
      %194 = arith.mulf %193, %192 : vector<2x256xf32>
      %195 = vector.broadcast %26 : f32 to vector<2x256xf32>
      %196 = arith.mulf %195, %17 : vector<2x256xf32>
      %197 = vector.broadcast %75 : f32 to vector<2x256xf32>
      %198 = arith.mulf %197, %18 : vector<2x256xf32>
      %199 = arith.addf %196, %198 : vector<2x256xf32>
      %c35_i32 = arith.constant 35 : i32
      %200 = tpu.dynamic_rotate %199 by %c35_i32 dim 1 : vector<2x256xf32>, i32 -> vector<2x256xf32>
      %201 = vector.broadcast %124 : vector<1x256xf32> to vector<2x256xf32>
      %202 = arith.mulf %201, %200 : vector<2x256xf32>
      %203 = vector.broadcast %27 : f32 to vector<2x256xf32>
      %204 = arith.mulf %203, %17 : vector<2x256xf32>
      %205 = vector.broadcast %76 : f32 to vector<2x256xf32>
      %206 = arith.mulf %205, %18 : vector<2x256xf32>
      %207 = arith.addf %204, %206 : vector<2x256xf32>
      %c34_i32 = arith.constant 34 : i32
      %208 = tpu.dynamic_rotate %207 by %c34_i32 dim 1 : vector<2x256xf32>, i32 -> vector<2x256xf32>
      %209 = vector.broadcast %125 : vector<1x256xf32> to vector<2x256xf32>
      %210 = arith.mulf %209, %208 : vector<2x256xf32>
      %211 = arith.addf %202, %210 : vector<2x256xf32>
      %212 = vector.broadcast %28 : f32 to vector<2x256xf32>
      %213 = arith.mulf %212, %17 : vector<2x256xf32>
      %214 = vector.broadcast %77 : f32 to vector<2x256xf32>
      %215 = arith.mulf %214, %18 : vector<2x256xf32>
      %216 = arith.addf %213, %215 : vector<2x256xf32>
      %c33_i32 = arith.constant 33 : i32
      %217 = tpu.dynamic_rotate %216 by %c33_i32 dim 1 : vector<2x256xf32>, i32 -> vector<2x256xf32>
      %218 = vector.broadcast %126 : vector<1x256xf32> to vector<2x256xf32>
      %219 = arith.mulf %218, %217 : vector<2x256xf32>
      %220 = arith.addf %211, %219 : vector<2x256xf32>
      %221 = vector.broadcast %29 : f32 to vector<2x256xf32>
      %222 = arith.mulf %221, %17 : vector<2x256xf32>
      %223 = vector.broadcast %78 : f32 to vector<2x256xf32>
      %224 = arith.mulf %223, %18 : vector<2x256xf32>
      %225 = arith.addf %222, %224 : vector<2x256xf32>
      %c32_i32 = arith.constant 32 : i32
      %226 = tpu.dynamic_rotate %225 by %c32_i32 dim 1 : vector<2x256xf32>, i32 -> vector<2x256xf32>
      %227 = vector.broadcast %127 : vector<1x256xf32> to vector<2x256xf32>
      %228 = arith.mulf %227, %226 : vector<2x256xf32>
      %229 = arith.addf %220, %228 : vector<2x256xf32>
      %230 = vector.broadcast %30 : f32 to vector<2x256xf32>
      %231 = arith.mulf %230, %17 : vector<2x256xf32>
      %232 = vector.broadcast %79 : f32 to vector<2x256xf32>
      %233 = arith.mulf %232, %18 : vector<2x256xf32>
      %234 = arith.addf %231, %233 : vector<2x256xf32>
      %c31_i32 = arith.constant 31 : i32
      %235 = tpu.dynamic_rotate %234 by %c31_i32 dim 1 : vector<2x256xf32>, i32 -> vector<2x256xf32>
      %236 = vector.broadcast %128 : vector<1x256xf32> to vector<2x256xf32>
      %237 = arith.mulf %236, %235 : vector<2x256xf32>
      %238 = arith.addf %229, %237 : vector<2x256xf32>
      %239 = vector.broadcast %31 : f32 to vector<2x256xf32>
      %240 = arith.mulf %239, %17 : vector<2x256xf32>
      %241 = vector.broadcast %80 : f32 to vector<2x256xf32>
      %242 = arith.mulf %241, %18 : vector<2x256xf32>
      %243 = arith.addf %240, %242 : vector<2x256xf32>
      %c30_i32 = arith.constant 30 : i32
      %244 = tpu.dynamic_rotate %243 by %c30_i32 dim 1 : vector<2x256xf32>, i32 -> vector<2x256xf32>
      %245 = vector.broadcast %129 : vector<1x256xf32> to vector<2x256xf32>
      %246 = arith.mulf %245, %244 : vector<2x256xf32>
      %247 = arith.addf %238, %246 : vector<2x256xf32>
      %248 = vector.broadcast %32 : f32 to vector<2x256xf32>
      %249 = arith.mulf %248, %17 : vector<2x256xf32>
      %250 = vector.broadcast %81 : f32 to vector<2x256xf32>
      %251 = arith.mulf %250, %18 : vector<2x256xf32>
      %252 = arith.addf %249, %251 : vector<2x256xf32>
      %c29_i32 = arith.constant 29 : i32
      %253 = tpu.dynamic_rotate %252 by %c29_i32 dim 1 : vector<2x256xf32>, i32 -> vector<2x256xf32>
      %254 = vector.broadcast %130 : vector<1x256xf32> to vector<2x256xf32>
      %255 = arith.mulf %254, %253 : vector<2x256xf32>
      %256 = arith.addf %247, %255 : vector<2x256xf32>
      %257 = vector.broadcast %118 : vector<1x256xf32> to vector<2x256xf32>
      %258 = arith.mulf %257, %256 : vector<2x256xf32>
      %259 = arith.addf %194, %258 : vector<2x256xf32>
      %260 = vector.broadcast %33 : f32 to vector<2x256xf32>
      %261 = arith.mulf %260, %17 : vector<2x256xf32>
      %262 = vector.broadcast %82 : f32 to vector<2x256xf32>
      %263 = arith.mulf %262, %18 : vector<2x256xf32>
      %264 = arith.addf %261, %263 : vector<2x256xf32>
      %c19_i32 = arith.constant 19 : i32
      %265 = tpu.dynamic_rotate %264 by %c19_i32 dim 1 : vector<2x256xf32>, i32 -> vector<2x256xf32>
      %266 = vector.broadcast %124 : vector<1x256xf32> to vector<2x256xf32>
      %267 = arith.mulf %266, %265 : vector<2x256xf32>
      %268 = vector.broadcast %34 : f32 to vector<2x256xf32>
      %269 = arith.mulf %268, %17 : vector<2x256xf32>
      %270 = vector.broadcast %83 : f32 to vector<2x256xf32>
      %271 = arith.mulf %270, %18 : vector<2x256xf32>
      %272 = arith.addf %269, %271 : vector<2x256xf32>
      %c18_i32 = arith.constant 18 : i32
      %273 = tpu.dynamic_rotate %272 by %c18_i32 dim 1 : vector<2x256xf32>, i32 -> vector<2x256xf32>
      %274 = vector.broadcast %125 : vector<1x256xf32> to vector<2x256xf32>
      %275 = arith.mulf %274, %273 : vector<2x256xf32>
      %276 = arith.addf %267, %275 : vector<2x256xf32>
      %277 = vector.broadcast %35 : f32 to vector<2x256xf32>
      %278 = arith.mulf %277, %17 : vector<2x256xf32>
      %279 = vector.broadcast %84 : f32 to vector<2x256xf32>
      %280 = arith.mulf %279, %18 : vector<2x256xf32>
      %281 = arith.addf %278, %280 : vector<2x256xf32>
      %c17_i32 = arith.constant 17 : i32
      %282 = tpu.dynamic_rotate %281 by %c17_i32 dim 1 : vector<2x256xf32>, i32 -> vector<2x256xf32>
      %283 = vector.broadcast %126 : vector<1x256xf32> to vector<2x256xf32>
      %284 = arith.mulf %283, %282 : vector<2x256xf32>
      %285 = arith.addf %276, %284 : vector<2x256xf32>
      %286 = vector.broadcast %36 : f32 to vector<2x256xf32>
      %287 = arith.mulf %286, %17 : vector<2x256xf32>
      %288 = vector.broadcast %85 : f32 to vector<2x256xf32>
      %289 = arith.mulf %288, %18 : vector<2x256xf32>
      %290 = arith.addf %287, %289 : vector<2x256xf32>
      %c16_i32 = arith.constant 16 : i32
      %291 = tpu.dynamic_rotate %290 by %c16_i32 dim 1 : vector<2x256xf32>, i32 -> vector<2x256xf32>
      %292 = vector.broadcast %127 : vector<1x256xf32> to vector<2x256xf32>
      %293 = arith.mulf %292, %291 : vector<2x256xf32>
      %294 = arith.addf %285, %293 : vector<2x256xf32>
      %295 = vector.broadcast %37 : f32 to vector<2x256xf32>
      %296 = arith.mulf %295, %17 : vector<2x256xf32>
      %297 = vector.broadcast %86 : f32 to vector<2x256xf32>
      %298 = arith.mulf %297, %18 : vector<2x256xf32>
      %299 = arith.addf %296, %298 : vector<2x256xf32>
      %c15_i32 = arith.constant 15 : i32
      %300 = tpu.dynamic_rotate %299 by %c15_i32 dim 1 : vector<2x256xf32>, i32 -> vector<2x256xf32>
      %301 = vector.broadcast %128 : vector<1x256xf32> to vector<2x256xf32>
      %302 = arith.mulf %301, %300 : vector<2x256xf32>
      %303 = arith.addf %294, %302 : vector<2x256xf32>
      %304 = vector.broadcast %38 : f32 to vector<2x256xf32>
      %305 = arith.mulf %304, %17 : vector<2x256xf32>
      %306 = vector.broadcast %87 : f32 to vector<2x256xf32>
      %307 = arith.mulf %306, %18 : vector<2x256xf32>
      %308 = arith.addf %305, %307 : vector<2x256xf32>
      %c14_i32 = arith.constant 14 : i32
      %309 = tpu.dynamic_rotate %308 by %c14_i32 dim 1 : vector<2x256xf32>, i32 -> vector<2x256xf32>
      %310 = vector.broadcast %129 : vector<1x256xf32> to vector<2x256xf32>
      %311 = arith.mulf %310, %309 : vector<2x256xf32>
      %312 = arith.addf %303, %311 : vector<2x256xf32>
      %313 = vector.broadcast %39 : f32 to vector<2x256xf32>
      %314 = arith.mulf %313, %17 : vector<2x256xf32>
      %315 = vector.broadcast %88 : f32 to vector<2x256xf32>
      %316 = arith.mulf %315, %18 : vector<2x256xf32>
      %317 = arith.addf %314, %316 : vector<2x256xf32>
      %c13_i32 = arith.constant 13 : i32
      %318 = tpu.dynamic_rotate %317 by %c13_i32 dim 1 : vector<2x256xf32>, i32 -> vector<2x256xf32>
      %319 = vector.broadcast %130 : vector<1x256xf32> to vector<2x256xf32>
      %320 = arith.mulf %319, %318 : vector<2x256xf32>
      %321 = arith.addf %312, %320 : vector<2x256xf32>
      %322 = vector.broadcast %119 : vector<1x256xf32> to vector<2x256xf32>
      %323 = arith.mulf %322, %321 : vector<2x256xf32>
      %324 = arith.addf %259, %323 : vector<2x256xf32>
      %325 = vector.broadcast %40 : f32 to vector<2x256xf32>
      %326 = arith.mulf %325, %17 : vector<2x256xf32>
      %327 = vector.broadcast %89 : f32 to vector<2x256xf32>
      %328 = arith.mulf %327, %18 : vector<2x256xf32>
      %329 = arith.addf %326, %328 : vector<2x256xf32>
      %c3_i32 = arith.constant 3 : i32
      %330 = tpu.dynamic_rotate %329 by %c3_i32 dim 1 : vector<2x256xf32>, i32 -> vector<2x256xf32>
      %331 = vector.broadcast %124 : vector<1x256xf32> to vector<2x256xf32>
      %332 = arith.mulf %331, %330 : vector<2x256xf32>
      %333 = vector.broadcast %41 : f32 to vector<2x256xf32>
      %334 = arith.mulf %333, %17 : vector<2x256xf32>
      %335 = vector.broadcast %90 : f32 to vector<2x256xf32>
      %336 = arith.mulf %335, %18 : vector<2x256xf32>
      %337 = arith.addf %334, %336 : vector<2x256xf32>
      %c2_i32 = arith.constant 2 : i32
      %338 = tpu.dynamic_rotate %337 by %c2_i32 dim 1 : vector<2x256xf32>, i32 -> vector<2x256xf32>
      %339 = vector.broadcast %125 : vector<1x256xf32> to vector<2x256xf32>
      %340 = arith.mulf %339, %338 : vector<2x256xf32>
      %341 = arith.addf %332, %340 : vector<2x256xf32>
      %342 = vector.broadcast %42 : f32 to vector<2x256xf32>
      %343 = arith.mulf %342, %17 : vector<2x256xf32>
      %344 = vector.broadcast %91 : f32 to vector<2x256xf32>
      %345 = arith.mulf %344, %18 : vector<2x256xf32>
      %346 = arith.addf %343, %345 : vector<2x256xf32>
      %c1_i32 = arith.constant 1 : i32
      %347 = tpu.dynamic_rotate %346 by %c1_i32 dim 1 : vector<2x256xf32>, i32 -> vector<2x256xf32>
      %348 = vector.broadcast %126 : vector<1x256xf32> to vector<2x256xf32>
      %349 = arith.mulf %348, %347 : vector<2x256xf32>
      %350 = arith.addf %341, %349 : vector<2x256xf32>
      %351 = vector.broadcast %43 : f32 to vector<2x256xf32>
      %352 = arith.mulf %351, %17 : vector<2x256xf32>
      %353 = vector.broadcast %92 : f32 to vector<2x256xf32>
      %354 = arith.mulf %353, %18 : vector<2x256xf32>
      %355 = arith.addf %352, %354 : vector<2x256xf32>
      %356 = vector.broadcast %127 : vector<1x256xf32> to vector<2x256xf32>
      %357 = arith.mulf %356, %355 : vector<2x256xf32>
      %358 = arith.addf %350, %357 : vector<2x256xf32>
      %359 = vector.broadcast %44 : f32 to vector<2x256xf32>
      %360 = arith.mulf %359, %17 : vector<2x256xf32>
      %361 = vector.broadcast %93 : f32 to vector<2x256xf32>
      %362 = arith.mulf %361, %18 : vector<2x256xf32>
      %363 = arith.addf %360, %362 : vector<2x256xf32>
      %c255_i32 = arith.constant 255 : i32
      %364 = tpu.dynamic_rotate %363 by %c255_i32 dim 1 : vector<2x256xf32>, i32 -> vector<2x256xf32>
      %365 = vector.broadcast %128 : vector<1x256xf32> to vector<2x256xf32>
      %366 = arith.mulf %365, %364 : vector<2x256xf32>
      %367 = arith.addf %358, %366 : vector<2x256xf32>
      %368 = vector.broadcast %45 : f32 to vector<2x256xf32>
      %369 = arith.mulf %368, %17 : vector<2x256xf32>
      %370 = vector.broadcast %94 : f32 to vector<2x256xf32>
      %371 = arith.mulf %370, %18 : vector<2x256xf32>
      %372 = arith.addf %369, %371 : vector<2x256xf32>
      %c254_i32 = arith.constant 254 : i32
      %373 = tpu.dynamic_rotate %372 by %c254_i32 dim 1 : vector<2x256xf32>, i32 -> vector<2x256xf32>
      %374 = vector.broadcast %129 : vector<1x256xf32> to vector<2x256xf32>
      %375 = arith.mulf %374, %373 : vector<2x256xf32>
      %376 = arith.addf %367, %375 : vector<2x256xf32>
      %377 = vector.broadcast %46 : f32 to vector<2x256xf32>
      %378 = arith.mulf %377, %17 : vector<2x256xf32>
      %379 = vector.broadcast %95 : f32 to vector<2x256xf32>
      %380 = arith.mulf %379, %18 : vector<2x256xf32>
      %381 = arith.addf %378, %380 : vector<2x256xf32>
      %c253_i32 = arith.constant 253 : i32
      %382 = tpu.dynamic_rotate %381 by %c253_i32 dim 1 : vector<2x256xf32>, i32 -> vector<2x256xf32>
      %383 = vector.broadcast %130 : vector<1x256xf32> to vector<2x256xf32>
      %384 = arith.mulf %383, %382 : vector<2x256xf32>
      %385 = arith.addf %376, %384 : vector<2x256xf32>
      %386 = vector.broadcast %120 : vector<1x256xf32> to vector<2x256xf32>
      %387 = arith.mulf %386, %385 : vector<2x256xf32>
      %388 = arith.addf %324, %387 : vector<2x256xf32>
      %389 = vector.broadcast %47 : f32 to vector<2x256xf32>
      %390 = arith.mulf %389, %17 : vector<2x256xf32>
      %391 = vector.broadcast %96 : f32 to vector<2x256xf32>
      %392 = arith.mulf %391, %18 : vector<2x256xf32>
      %393 = arith.addf %390, %392 : vector<2x256xf32>
      %c243_i32 = arith.constant 243 : i32
      %394 = tpu.dynamic_rotate %393 by %c243_i32 dim 1 : vector<2x256xf32>, i32 -> vector<2x256xf32>
      %395 = vector.broadcast %124 : vector<1x256xf32> to vector<2x256xf32>
      %396 = arith.mulf %395, %394 : vector<2x256xf32>
      %397 = vector.broadcast %48 : f32 to vector<2x256xf32>
      %398 = arith.mulf %397, %17 : vector<2x256xf32>
      %399 = vector.broadcast %97 : f32 to vector<2x256xf32>
      %400 = arith.mulf %399, %18 : vector<2x256xf32>
      %401 = arith.addf %398, %400 : vector<2x256xf32>
      %c242_i32 = arith.constant 242 : i32
      %402 = tpu.dynamic_rotate %401 by %c242_i32 dim 1 : vector<2x256xf32>, i32 -> vector<2x256xf32>
      %403 = vector.broadcast %125 : vector<1x256xf32> to vector<2x256xf32>
      %404 = arith.mulf %403, %402 : vector<2x256xf32>
      %405 = arith.addf %396, %404 : vector<2x256xf32>
      %406 = vector.broadcast %49 : f32 to vector<2x256xf32>
      %407 = arith.mulf %406, %17 : vector<2x256xf32>
      %408 = vector.broadcast %98 : f32 to vector<2x256xf32>
      %409 = arith.mulf %408, %18 : vector<2x256xf32>
      %410 = arith.addf %407, %409 : vector<2x256xf32>
      %c241_i32 = arith.constant 241 : i32
      %411 = tpu.dynamic_rotate %410 by %c241_i32 dim 1 : vector<2x256xf32>, i32 -> vector<2x256xf32>
      %412 = vector.broadcast %126 : vector<1x256xf32> to vector<2x256xf32>
      %413 = arith.mulf %412, %411 : vector<2x256xf32>
      %414 = arith.addf %405, %413 : vector<2x256xf32>
      %415 = vector.broadcast %50 : f32 to vector<2x256xf32>
      %416 = arith.mulf %415, %17 : vector<2x256xf32>
      %417 = vector.broadcast %99 : f32 to vector<2x256xf32>
      %418 = arith.mulf %417, %18 : vector<2x256xf32>
      %419 = arith.addf %416, %418 : vector<2x256xf32>
      %c240_i32 = arith.constant 240 : i32
      %420 = tpu.dynamic_rotate %419 by %c240_i32 dim 1 : vector<2x256xf32>, i32 -> vector<2x256xf32>
      %421 = vector.broadcast %127 : vector<1x256xf32> to vector<2x256xf32>
      %422 = arith.mulf %421, %420 : vector<2x256xf32>
      %423 = arith.addf %414, %422 : vector<2x256xf32>
      %424 = vector.broadcast %51 : f32 to vector<2x256xf32>
      %425 = arith.mulf %424, %17 : vector<2x256xf32>
      %426 = vector.broadcast %100 : f32 to vector<2x256xf32>
      %427 = arith.mulf %426, %18 : vector<2x256xf32>
      %428 = arith.addf %425, %427 : vector<2x256xf32>
      %c239_i32 = arith.constant 239 : i32
      %429 = tpu.dynamic_rotate %428 by %c239_i32 dim 1 : vector<2x256xf32>, i32 -> vector<2x256xf32>
      %430 = vector.broadcast %128 : vector<1x256xf32> to vector<2x256xf32>
      %431 = arith.mulf %430, %429 : vector<2x256xf32>
      %432 = arith.addf %423, %431 : vector<2x256xf32>
      %433 = vector.broadcast %52 : f32 to vector<2x256xf32>
      %434 = arith.mulf %433, %17 : vector<2x256xf32>
      %435 = vector.broadcast %101 : f32 to vector<2x256xf32>
      %436 = arith.mulf %435, %18 : vector<2x256xf32>
      %437 = arith.addf %434, %436 : vector<2x256xf32>
      %c238_i32 = arith.constant 238 : i32
      %438 = tpu.dynamic_rotate %437 by %c238_i32 dim 1 : vector<2x256xf32>, i32 -> vector<2x256xf32>
      %439 = vector.broadcast %129 : vector<1x256xf32> to vector<2x256xf32>
      %440 = arith.mulf %439, %438 : vector<2x256xf32>
      %441 = arith.addf %432, %440 : vector<2x256xf32>
      %442 = vector.broadcast %53 : f32 to vector<2x256xf32>
      %443 = arith.mulf %442, %17 : vector<2x256xf32>
      %444 = vector.broadcast %102 : f32 to vector<2x256xf32>
      %445 = arith.mulf %444, %18 : vector<2x256xf32>
      %446 = arith.addf %443, %445 : vector<2x256xf32>
      %c237_i32 = arith.constant 237 : i32
      %447 = tpu.dynamic_rotate %446 by %c237_i32 dim 1 : vector<2x256xf32>, i32 -> vector<2x256xf32>
      %448 = vector.broadcast %130 : vector<1x256xf32> to vector<2x256xf32>
      %449 = arith.mulf %448, %447 : vector<2x256xf32>
      %450 = arith.addf %441, %449 : vector<2x256xf32>
      %451 = vector.broadcast %121 : vector<1x256xf32> to vector<2x256xf32>
      %452 = arith.mulf %451, %450 : vector<2x256xf32>
      %453 = arith.addf %388, %452 : vector<2x256xf32>
      %454 = vector.broadcast %54 : f32 to vector<2x256xf32>
      %455 = arith.mulf %454, %17 : vector<2x256xf32>
      %456 = vector.broadcast %103 : f32 to vector<2x256xf32>
      %457 = arith.mulf %456, %18 : vector<2x256xf32>
      %458 = arith.addf %455, %457 : vector<2x256xf32>
      %c227_i32 = arith.constant 227 : i32
      %459 = tpu.dynamic_rotate %458 by %c227_i32 dim 1 : vector<2x256xf32>, i32 -> vector<2x256xf32>
      %460 = vector.broadcast %124 : vector<1x256xf32> to vector<2x256xf32>
      %461 = arith.mulf %460, %459 : vector<2x256xf32>
      %462 = vector.broadcast %55 : f32 to vector<2x256xf32>
      %463 = arith.mulf %462, %17 : vector<2x256xf32>
      %464 = vector.broadcast %104 : f32 to vector<2x256xf32>
      %465 = arith.mulf %464, %18 : vector<2x256xf32>
      %466 = arith.addf %463, %465 : vector<2x256xf32>
      %c226_i32 = arith.constant 226 : i32
      %467 = tpu.dynamic_rotate %466 by %c226_i32 dim 1 : vector<2x256xf32>, i32 -> vector<2x256xf32>
      %468 = vector.broadcast %125 : vector<1x256xf32> to vector<2x256xf32>
      %469 = arith.mulf %468, %467 : vector<2x256xf32>
      %470 = arith.addf %461, %469 : vector<2x256xf32>
      %471 = vector.broadcast %56 : f32 to vector<2x256xf32>
      %472 = arith.mulf %471, %17 : vector<2x256xf32>
      %473 = vector.broadcast %105 : f32 to vector<2x256xf32>
      %474 = arith.mulf %473, %18 : vector<2x256xf32>
      %475 = arith.addf %472, %474 : vector<2x256xf32>
      %c225_i32 = arith.constant 225 : i32
      %476 = tpu.dynamic_rotate %475 by %c225_i32 dim 1 : vector<2x256xf32>, i32 -> vector<2x256xf32>
      %477 = vector.broadcast %126 : vector<1x256xf32> to vector<2x256xf32>
      %478 = arith.mulf %477, %476 : vector<2x256xf32>
      %479 = arith.addf %470, %478 : vector<2x256xf32>
      %480 = vector.broadcast %57 : f32 to vector<2x256xf32>
      %481 = arith.mulf %480, %17 : vector<2x256xf32>
      %482 = vector.broadcast %106 : f32 to vector<2x256xf32>
      %483 = arith.mulf %482, %18 : vector<2x256xf32>
      %484 = arith.addf %481, %483 : vector<2x256xf32>
      %c224_i32 = arith.constant 224 : i32
      %485 = tpu.dynamic_rotate %484 by %c224_i32 dim 1 : vector<2x256xf32>, i32 -> vector<2x256xf32>
      %486 = vector.broadcast %127 : vector<1x256xf32> to vector<2x256xf32>
      %487 = arith.mulf %486, %485 : vector<2x256xf32>
      %488 = arith.addf %479, %487 : vector<2x256xf32>
      %489 = vector.broadcast %58 : f32 to vector<2x256xf32>
      %490 = arith.mulf %489, %17 : vector<2x256xf32>
      %491 = vector.broadcast %107 : f32 to vector<2x256xf32>
      %492 = arith.mulf %491, %18 : vector<2x256xf32>
      %493 = arith.addf %490, %492 : vector<2x256xf32>
      %c223_i32 = arith.constant 223 : i32
      %494 = tpu.dynamic_rotate %493 by %c223_i32 dim 1 : vector<2x256xf32>, i32 -> vector<2x256xf32>
      %495 = vector.broadcast %128 : vector<1x256xf32> to vector<2x256xf32>
      %496 = arith.mulf %495, %494 : vector<2x256xf32>
      %497 = arith.addf %488, %496 : vector<2x256xf32>
      %498 = vector.broadcast %59 : f32 to vector<2x256xf32>
      %499 = arith.mulf %498, %17 : vector<2x256xf32>
      %500 = vector.broadcast %108 : f32 to vector<2x256xf32>
      %501 = arith.mulf %500, %18 : vector<2x256xf32>
      %502 = arith.addf %499, %501 : vector<2x256xf32>
      %c222_i32 = arith.constant 222 : i32
      %503 = tpu.dynamic_rotate %502 by %c222_i32 dim 1 : vector<2x256xf32>, i32 -> vector<2x256xf32>
      %504 = vector.broadcast %129 : vector<1x256xf32> to vector<2x256xf32>
      %505 = arith.mulf %504, %503 : vector<2x256xf32>
      %506 = arith.addf %497, %505 : vector<2x256xf32>
      %507 = vector.broadcast %60 : f32 to vector<2x256xf32>
      %508 = arith.mulf %507, %17 : vector<2x256xf32>
      %509 = vector.broadcast %109 : f32 to vector<2x256xf32>
      %510 = arith.mulf %509, %18 : vector<2x256xf32>
      %511 = arith.addf %508, %510 : vector<2x256xf32>
      %c221_i32 = arith.constant 221 : i32
      %512 = tpu.dynamic_rotate %511 by %c221_i32 dim 1 : vector<2x256xf32>, i32 -> vector<2x256xf32>
      %513 = vector.broadcast %130 : vector<1x256xf32> to vector<2x256xf32>
      %514 = arith.mulf %513, %512 : vector<2x256xf32>
      %515 = arith.addf %506, %514 : vector<2x256xf32>
      %516 = vector.broadcast %122 : vector<1x256xf32> to vector<2x256xf32>
      %517 = arith.mulf %516, %515 : vector<2x256xf32>
      %518 = arith.addf %453, %517 : vector<2x256xf32>
      %519 = vector.broadcast %61 : f32 to vector<2x256xf32>
      %520 = arith.mulf %519, %17 : vector<2x256xf32>
      %521 = vector.broadcast %110 : f32 to vector<2x256xf32>
      %522 = arith.mulf %521, %18 : vector<2x256xf32>
      %523 = arith.addf %520, %522 : vector<2x256xf32>
      %c211_i32 = arith.constant 211 : i32
      %524 = tpu.dynamic_rotate %523 by %c211_i32 dim 1 : vector<2x256xf32>, i32 -> vector<2x256xf32>
      %525 = vector.broadcast %124 : vector<1x256xf32> to vector<2x256xf32>
      %526 = arith.mulf %525, %524 : vector<2x256xf32>
      %527 = vector.broadcast %62 : f32 to vector<2x256xf32>
      %528 = arith.mulf %527, %17 : vector<2x256xf32>
      %529 = vector.broadcast %111 : f32 to vector<2x256xf32>
      %530 = arith.mulf %529, %18 : vector<2x256xf32>
      %531 = arith.addf %528, %530 : vector<2x256xf32>
      %c210_i32 = arith.constant 210 : i32
      %532 = tpu.dynamic_rotate %531 by %c210_i32 dim 1 : vector<2x256xf32>, i32 -> vector<2x256xf32>
      %533 = vector.broadcast %125 : vector<1x256xf32> to vector<2x256xf32>
      %534 = arith.mulf %533, %532 : vector<2x256xf32>
      %535 = arith.addf %526, %534 : vector<2x256xf32>
      %536 = vector.broadcast %63 : f32 to vector<2x256xf32>
      %537 = arith.mulf %536, %17 : vector<2x256xf32>
      %538 = vector.broadcast %112 : f32 to vector<2x256xf32>
      %539 = arith.mulf %538, %18 : vector<2x256xf32>
      %540 = arith.addf %537, %539 : vector<2x256xf32>
      %c209_i32 = arith.constant 209 : i32
      %541 = tpu.dynamic_rotate %540 by %c209_i32 dim 1 : vector<2x256xf32>, i32 -> vector<2x256xf32>
      %542 = vector.broadcast %126 : vector<1x256xf32> to vector<2x256xf32>
      %543 = arith.mulf %542, %541 : vector<2x256xf32>
      %544 = arith.addf %535, %543 : vector<2x256xf32>
      %545 = vector.broadcast %64 : f32 to vector<2x256xf32>
      %546 = arith.mulf %545, %17 : vector<2x256xf32>
      %547 = vector.broadcast %113 : f32 to vector<2x256xf32>
      %548 = arith.mulf %547, %18 : vector<2x256xf32>
      %549 = arith.addf %546, %548 : vector<2x256xf32>
      %c208_i32 = arith.constant 208 : i32
      %550 = tpu.dynamic_rotate %549 by %c208_i32 dim 1 : vector<2x256xf32>, i32 -> vector<2x256xf32>
      %551 = vector.broadcast %127 : vector<1x256xf32> to vector<2x256xf32>
      %552 = arith.mulf %551, %550 : vector<2x256xf32>
      %553 = arith.addf %544, %552 : vector<2x256xf32>
      %554 = vector.broadcast %65 : f32 to vector<2x256xf32>
      %555 = arith.mulf %554, %17 : vector<2x256xf32>
      %556 = vector.broadcast %114 : f32 to vector<2x256xf32>
      %557 = arith.mulf %556, %18 : vector<2x256xf32>
      %558 = arith.addf %555, %557 : vector<2x256xf32>
      %c207_i32 = arith.constant 207 : i32
      %559 = tpu.dynamic_rotate %558 by %c207_i32 dim 1 : vector<2x256xf32>, i32 -> vector<2x256xf32>
      %560 = vector.broadcast %128 : vector<1x256xf32> to vector<2x256xf32>
      %561 = arith.mulf %560, %559 : vector<2x256xf32>
      %562 = arith.addf %553, %561 : vector<2x256xf32>
      %563 = vector.broadcast %66 : f32 to vector<2x256xf32>
      %564 = arith.mulf %563, %17 : vector<2x256xf32>
      %565 = vector.broadcast %115 : f32 to vector<2x256xf32>
      %566 = arith.mulf %565, %18 : vector<2x256xf32>
      %567 = arith.addf %564, %566 : vector<2x256xf32>
      %c206_i32 = arith.constant 206 : i32
      %568 = tpu.dynamic_rotate %567 by %c206_i32 dim 1 : vector<2x256xf32>, i32 -> vector<2x256xf32>
      %569 = vector.broadcast %129 : vector<1x256xf32> to vector<2x256xf32>
      %570 = arith.mulf %569, %568 : vector<2x256xf32>
      %571 = arith.addf %562, %570 : vector<2x256xf32>
      %572 = vector.broadcast %67 : f32 to vector<2x256xf32>
      %573 = arith.mulf %572, %17 : vector<2x256xf32>
      %574 = vector.broadcast %116 : f32 to vector<2x256xf32>
      %575 = arith.mulf %574, %18 : vector<2x256xf32>
      %576 = arith.addf %573, %575 : vector<2x256xf32>
      %c205_i32 = arith.constant 205 : i32
      %577 = tpu.dynamic_rotate %576 by %c205_i32 dim 1 : vector<2x256xf32>, i32 -> vector<2x256xf32>
      %578 = vector.broadcast %130 : vector<1x256xf32> to vector<2x256xf32>
      %579 = arith.mulf %578, %577 : vector<2x256xf32>
      %580 = arith.addf %571, %579 : vector<2x256xf32>
      %581 = vector.broadcast %123 : vector<1x256xf32> to vector<2x256xf32>
      %582 = arith.mulf %581, %580 : vector<2x256xf32>
      %583 = arith.addf %518, %582 : vector<2x256xf32>
      %584 = arith.negf %583 : vector<2x256xf32>
      %585 = math.exp %584 : vector<2x256xf32>
      %cst_48 = arith.constant 1.000000e+00 : f32
      %586 = vector.broadcast %cst_48 : f32 to vector<2x256xf32>
      %587 = arith.addf %586, %585 : vector<2x256xf32>
      %588 = arith.divf %586, %587 : vector<2x256xf32>
      %c0_49 = arith.constant 0 : index
      %c0_50 = arith.constant 0 : index
      %589 = vector.load %arg6[%c0_49, %c0_50] : memref<2x256xf32, #tpu.memory_space<vmem>>, vector<2x256xf32>
      tpu.vector_store %arg6[%c0_49, %c0_50], %588 {strides = array<i32>} : memref<2x256xf32, #tpu.memory_space<vmem>>, vector<2x256xf32>,
    } else {
    }
    return
  }
  func.func @transform_0(%arg0: i32, %arg1: i32) -> i32 {
    %c0_i32 = arith.constant 0 : i32
    %c0_i32_0 = arith.constant 0 : i32
    return %c0_i32 : i32
  }
  func.func @transform_1(%arg0: i32, %arg1: i32) -> (i32, i32) {
    %c0_i32 = arith.constant 0 : i32
    %c0_i32_0 = arith.constant 0 : i32
    %c0_i32_1 = arith.constant 0 : i32
    return %c0_i32, %c0_i32_0 : i32, i32
  }
  func.func @transform_2(%arg0: i32, %arg1: i32) -> (i32, i32) {
    %c0_i32 = arith.constant 0 : i32
    %c0_i32_0 = arith.constant 0 : i32
    %c0_i32_1 = arith.constant 0 : i32
    return %c0_i32, %c0_i32_0 : i32, i32
  }
  func.func @transform_3(%arg0: i32, %arg1: i32) -> (i32, i32, i32) {
    %c0_i32 = arith.constant 0 : i32
    %c0_i32_0 = arith.constant 0 : i32
    return %arg0, %arg1, %c0_i32 : i32, i32, i32
  }
  func.func @transform_4(%arg0: i32, %arg1: i32) -> (i32, i32) {
    %c0_i32 = arith.constant 0 : i32
    %c0_i32_0 = arith.constant 0 : i32
    return %arg0, %c0_i32 : i32, i32
  }
}

</mosaic_0001>

<bundles_post_ra>
// kernel: tpu_custom_call.1
= control target key start
LH: loop header
LB: loop body
LE: loop exit
PB: predicated region body
PF: predicated region fallthrough
CT: control target
= control target key end

     0   :  { %9 = vsyncpa [#allocation7], 0  ;;  %s3058_s0 = inlined_call_operand.hbm [shape: f32[98], index: 0, kind: input, shape index: {}]   ;;  %s3059_s1 = inlined_call_operand.hbm [shape: f32[7,256], index: 1, kind: input, shape index: {}]   ;;  %s3060_s2 = inlined_call_operand.hbm [shape: f32[7,256], index: 2, kind: input, shape index: {}]   ;;  %s3061_s3 = inlined_call_operand.hbm [shape: f32[2,4,256], index: 3, kind: input, shape index: {}]   ;;  %s3062_s4 = inlined_call_operand.hbm [shape: f32[2,256], index: 4, kind: output, shape index: {}]  }
   0x1   :  { %10 = vsyncpa [#allocation5], 0 }
   0x2   :  { %11 = vsyncpa [#allocation10], 0 }
   0x3   :  { %12 = vsyncpa [#allocation6], 0  ;;  %s2125_s15 = smov [#allocation9]   ;;  %s2126_s17 = smov [#allocation8]  }
   0x4   :  { %s37_s16 = sshll.u32 %s2125_s15, 4  ;;  %s27_s18 = sshll.u32 %s2126_s17, 4  ;;  %s38_s16 = int_to_ptr.vmem [resolvable:$true] %s37_s16  ;;  %s28_s18 = int_to_ptr.vmem [resolvable:$true] %s27_s18 }
   0x5   :  { %s2037_s19 = scalar_lea.vmem %s38_s16, 256  ;;  %p2042_p1 = scmp.lt.s32.totalorder %s38_s16, %s38_s16 }
   0x6   :  { %p2038_p0 = scmp.ne.s32.totalorder %s38_s16, %s2037_s19  ;;  %p2043_p2 = scmp.lt.s32.totalorder %s2037_s19, %s2037_s19 }
   0x8   :  { %p2044_p3 = por %p2043_p2, %p2042_p1 }
   0xa   :  { %p2045_p4 = pnand %p2044_p3, %p2038_p0 }
   0xc   :  { %2048 = shalt.err (!%p2045_p4)
}
   0xd   :  { %40 = dma.hbm_to_vmem [thread:$0]  %s3060_s2, 256, %s38_s16, [#allocation10]  }
   0xe   :  { %s2127_s22 = smov [#allocation4]   ;;  %s2065_s25 = scalar_lea.vmem %s28_s18, 256 }
   0xf   :  { %20 = dma.hbm_to_smem %s3058_s0, 16, %s2127_s22, [#allocation7]  }
  0x10   :  { %p2066_p5 = scmp.ne.s32.totalorder %s28_s18, %s2065_s25  ;;  %p2070_p6 = scmp.lt.s32.totalorder %s28_s18, %s28_s18 }
  0x11   :  { %p2071_p7 = scmp.lt.s32.totalorder %s2065_s25, %s2065_s25 }
  0x13   :  { %p2072_p8 = por %p2071_p7, %p2070_p6 }
  0x15   :  { %p2073_p9 = pnand %p2072_p8, %p2066_p5 }
  0x17   :  { %2076 = shalt.err (!%p2073_p9)
}
  0x18   :  { %30 = dma.hbm_to_vmem [thread:$0]  %s3059_s1, 256, %s28_s18, [#allocation5]  }
  0x19   :  { %s2128_s28 = smov [#allocation11]  }
  0x1a   :  { %s46_s29 = sshll.u32 %s2128_s28, 4  ;;  %s47_s29 = int_to_ptr.vmem [resolvable:$true] %s46_s29 }
  0x1b   :  { %s2085_s2 = scalar_lea.vmem %s47_s29, 256  ;;  %p2090_p11 = scmp.lt.s32.totalorder %s47_s29, %s47_s29 }
  0x1c   :  { %p2086_p10 = scmp.ne.s32.totalorder %s47_s29, %s2085_s2  ;;  %p2091_p12 = scmp.lt.s32.totalorder %s2085_s2, %s2085_s2 }
  0x1e   :  { %p2092_p13 = por %p2091_p12, %p2090_p11 }
  0x20   :  { %p2093_p0 = pnand %p2092_p13, %p2086_p10 }
  0x22   :  { %2096 = shalt.err (!%p2093_p0)
}
  0x23   :  { %s2129_s0 = smov 128   ;;  %s2130_s30 = smov 8  }
  0x24   :  { %52 = dma.hbm_to_vmem [thread:$0]  %s3061_s3, 256, %s47_s29, [#allocation10], %s2129_s0, %s2129_s0, %s2130_s30  }
  0x25   :  { %2117 = dma.done.wait [#allocation7], 16  }
  0x26   :  { %2118 = vsyncadd [#allocation7], 4294967280 }
  0x27   :  { %2119 = dma.done.wait [#allocation5], 256  }
  0x28   :  { %2120 = vsyncadd [#allocation5], 4294967040 }
  0x29   :  { %2121 = dma.done.wait [#allocation10], 512  }
  0x2a   :  { %2122 = vsyncadd [#allocation10], 4294966784 }
  0x2b   :  { %65 = sfence }
  0x2c   :  { %v72_v0 = vld [vmem:[#allocation11] sm:$0xff]  ;;  %v73_v1 = vld [vmem:[#allocation11 + $0x8] sm:$0xff]  ;;  %vm81_vm0 = vcmask 1043456   ;;  %v118_v2 = vlaneseq  ;;  %v2131_v3 = vmov 0.0   ;;  %v2132_v4 = vmov -inf   ;;  %s1860_s1 = sld [smem:[#allocation4 + $0x1]] }
  0x2d   :  { %70 = vst [vmem:[#allocation2] sm:$0xf] %v2131_v3  ;;  %71 = vst [vmem:[#allocation3] sm:$0xf] %v2132_v4  ;;  %v77_v5 = vcombine.high %v72_v0, %v72_v0  ;;  %v78_v6 = vcombine.high %v73_v1, %v73_v1  ;;  %v82_v7 = vsel %vm81_vm0, %v72_v0, 0.0  ;;  %v96_v8 = vsel %vm81_vm0, %v73_v1, 0.0 }
  0x2e   :  { %v83_v9 = vrot.slane %v82_v7, 4  ;;  %v97_v10 = vrot.slane %v96_v8, 4  ;;  %v2133_v13 = vmov 1983009808   ;;  %v2225_v19 = vshrl.u32 %v118_v2, 7  ;;  %s2242_s3 = sld [smem:[#allocation4 + $0x32]] }
  0x2f   :  { %v89_v11 = vsel %vm81_vm0, %v77_v5, 0.0  ;;  %v103_v12 = vsel %vm81_vm0, %v78_v6, 0.0  ;;  %v116_v14 = vunpack.c.l.s4 %v2133_v13  ;;  %v147_v25 = vsel %vm81_vm0, %v72_v0, -inf  ;;  %s211_s7 = sld [smem:[#allocation4]]  ;;  %s2134_s20 = smov 50  }
  0x30   :  { %v84_v15 = vadd.f32 %v83_v9, %v82_v7  ;;  %v90_v16 = vrot.slane %v89_v11, 4  ;;  %v98_v17 = vadd.f32 %v97_v10, %v96_v8  ;;  %v104_v18 = vrot.slane %v103_v12, 4  ;;  %s1861_s8 = sld [smem:[#allocation4 + $0x2]]  ;;  %s2135_s21 = smov 51  }
  0x31   :  { %v117_v24 = vunpack.c.0.s8 %v116_v14  ;;  %v154_v26 = vsel %vm81_vm0, %v77_v5, -inf  ;;  %v161_v27 = vsel %vm81_vm0, %v73_v1, -inf  ;;  %v148_v32 = vrot.slane %v147_v25, 4  ;;  %s1908_s9 = sld [smem:[#allocation4 + $0x31]]  ;;  %s2136_s23 = smov 49  }
  0x32   :  { %v85_v20 = vrot.slane %v84_v15, 2  ;;  %v91_v21 = vadd.f32 %v90_v16, %v89_v11  ;;  %v99_v22 = vrot.slane %v98_v17, 2  ;;  %v105_v23 = vadd.f32 %v104_v18, %v103_v12  ;;  %s1910_s10 = sld [smem:[#allocation4 + $0x33]]  ;;  %s2137_s26 = smov 48  }
  0x33   :  { %v155_v33 = vrot.slane %v154_v26, 4  ;;  %v162_v34 = vrot.slane %v161_v27, 4  ;;  %v168_v35 = vsel %vm81_vm0, %v78_v6, -inf  ;;  %v149_v40 = vmax.f32 %v147_v25, %v148_v32  ;;  %s1862_s11 = sld [smem:[#allocation4 + $0x3]]  ;;  %s2138_s29 = smov 47  }
  0x34   :  { %v86_v28 = vadd.f32 %v85_v20, %v84_v15  ;;  %v92_v29 = vrot.slane %v91_v21, 2  ;;  %v100_v30 = vadd.f32 %v99_v22, %v98_v17  ;;  %v106_v31 = vrot.slane %v105_v23, 2  ;;  %v74_v12 = vld [vmem:[#allocation2] sm:$0xf]  ;;  %s1911_s12 = sld [smem:[#allocation4 + $0x34]]  ;;  %s2139_s5 = smov 46  }
  0x35   :  { %v156_v41 = vmax.f32 %v154_v26, %v155_v33  ;;  %v163_v42 = vmax.f32 %v161_v27, %v162_v34  ;;  %v169_v43 = vrot.slane %v168_v35, 4  ;;  %v150_v48 = vrot.slane %v149_v40, 2  ;;  %s2248_s13 = sld [smem:[#allocation4 + $0x4]] }
  0x36   :  { %v87_v36 = vrot.slane %v86_v28, 1  ;;  %v93_v37 = vadd.f32 %v92_v29, %v91_v21  ;;  %v101_v38 = vrot.slane %v100_v30, 1  ;;  %v107_v39 = vadd.f32 %v106_v31, %v105_v23  ;;  %v146_v23 = vld [vmem:[#allocation3] sm:$0xf]  ;;  %s2250_s14 = sld [smem:[#allocation4 + $0x35]] }
  0x37   :  { %v157_v49 = vrot.slane %v156_v41, 2  ;;  %v164_v50 = vrot.slane %v163_v42, 2  ;;  %v170_v51 = vmax.f32 %v168_v35, %v169_v43  ;;  %v2232_v54 = vsub.s32 %v117_v24, %v2225_v19  ;;  %s2255_s15 = sld [smem:[#allocation4 + $0x5]] }
  0x38   :  { %v88_v44 = vadd.f32 %v87_v36, %v86_v28  ;;  %v94_v45 = vrot.slane %v93_v37, 1  ;;  %v102_v46 = vadd.f32 %v101_v38, %v100_v30  ;;  %v108_v47 = vrot.slane %v107_v39, 1  ;;  %s2260_s16 = sld [smem:[#allocation4 + $0x36]] }
  0x39   :  { %v151_v55 = vmax.f32 %v149_v40, %v150_v48  ;;  %v158_v56 = vmax.f32 %v156_v41, %v157_v49  ;;  %v165_v57 = vmax.f32 %v163_v42, %v164_v50  ;;  %v171_v58 = vrot.slane %v170_v51, 2  ;;  %s2270_s17 = sld [smem:[#allocation4 + $0x6]] }
  0x3a   :  { %v95_v52 = vadd.f32 %v94_v45, %v93_v37  ;;  %v109_v53 = vadd.f32 %v108_v47, %v107_v39  ;;  %vm135_vm1 = vcmask 1041409   ;;  %vm137_vm2 = vcmask 1043459   ;;  %s1914_s18 = sld [smem:[#allocation4 + $0x37]] }
  0x3b   :  { %v152_v61 = vrot.slane %v151_v55, 1  ;;  %v159_v62 = vrot.slane %v158_v56, 1  ;;  %v166_v63 = vrot.slane %v165_v57, 1  ;;  %v172_v0 = vmax.f32 %v170_v51, %v171_v58  ;;  %s2280_s19 = sld [smem:[#allocation4 + $0x7]] }
  0x3c   :  { %v114_v59 = vcombine.low %v88_v44, %v95_v52  ;;  %v122_v60 = vcombine.low %v102_v46, %v109_v53  ;;  %vm139_vm3 = vcmask 1045509   ;;  %vm141_vm4 = vcmask 1047559   ;;  %s1915_s22 = sld [smem:[#allocation4 + $0x38]] }
  0x3d   :  { %v153_v4 = vmax.f32 %v151_v55, %v152_v61  ;;  %v160_v5 = vmax.f32 %v158_v56, %v159_v62  ;;  %v167_v6 = vmax.f32 %v165_v57, %v166_v63  ;;  %v173_v7 = vrot.slane %v172_v0, 1  ;;  %s1867_s24 = sld [smem:[#allocation4 + $0x8]] }
  0x3e   :  { %v121_v1 = vrot.slane %v114_v59, %v2232_v54  ;;  %v129_v3 = vrot.slane %v122_v60, %v2232_v54  ;;  %v373_v30 = vstv %s1860_s1  ;;  %v335_v31 = vstv %s211_s7  ;;  %s2290_s25 = sld [smem:[#allocation4 + $0x39]] }
  0x3f   :  { %v174_v9 = vmax.f32 %v172_v0, %v173_v7  ;;  %v179_v10 = vcombine.low %v153_v4, %v160_v5  ;;  %v411_v32 = vstv %s1861_s8  ;;  %v375_v33 = vstv %s2242_s3  ;;  %s1868_s27 = sld [smem:[#allocation4 + $0x9]]  ;;  %s2140_s3 = smov 45  }
  0x40   :  { %v134_v8 = vrot.slane %v129_v3, 7  ;;  %v337_v34 = vstv %s1908_s9  ;;  %v413_v35 = vstv %s1910_s10  ;;  %v449_v39 = vstv %s1862_s11  ;;  %s2296_s28 = sld [smem:[#allocation4 + $0x3a]]  ;;  %s2141_s9 = smov 35  }
  0x41   :  { %v187_v14 = vcombine.low %v167_v6, %v174_v9  ;;  %v186_v17 = vrot.slane %v179_v10, %v2232_v54  ;;  %v451_v41 = vstv %s1911_s12  ;;  %v487_v46 = vstv %s2248_s13  ;;  %s1869_s2 = sld [smem:[#allocation4 + $0xa]]  ;;  %s2142_s12 = smov 34  }
  0x42   :  { %v136_v11 = vsel %vm135_vm1, %v134_v8, %v121_v1  ;;  %v489_v47 = vstv %s2250_s14  ;;  %v525_v57 = vstv %s2255_s15  ;;  %v527_v61 = vstv %s2260_s16  ;;  %s2302_s0 = sld [smem:[#allocation4 + $0x3b]]  ;;  %s2143_s14 = smov 33  }
  0x43   :  { %v138_v13 = vsel %vm137_vm2, %v134_v8, %v136_v11  ;;  %v194_v18 = vrot.slane %v187_v14, %v2232_v54  ;;  %v563_v0 = vstv %s2270_s17  ;;  %v565_v5 = vstv %s1914_s18  ;;  %s2305_s30 = sld [smem:[#allocation4 + $0xb]]  ;;  %s2144_s17 = smov 32  }
  0x44   :  { %v140_v15 = vsel %vm139_vm3, %v134_v8, %v138_v13  ;;  %s1919_s6 = sld [smem:[#allocation4 + $0x3c]] }
  0x45   :  { %v142_v16 = vsel %vm141_vm4, %v134_v8, %v140_v15  ;;  %v197_v21 = vrot.slane %v194_v18, 7  ;;  %v614_v8 = vstv %s2280_s19  ;;  %v639_v18 = vstv %s1867_s24  ;;  %s2312_s1 = sld [smem:[#allocation4 + $0xc]] }
  0x46   :  { %v144_v20 = vadd.f32 %v142_v16, %v74_v12  ;;  %v616_v12 = vstv %s1915_s22  ;;  %s1920_s7 = sld [smem:[#allocation4 + $0x3d]] }
  0x47   :  { %v198_v22 = vsel %vm135_vm1, %v197_v21, %v186_v17  ;;  %s2318_s8 = sld [smem:[#allocation4 + $0xd]] }
  0x48   :  { %145 = vst [vmem:[#allocation2] sm:$0xf] %v144_v20  ;;  %v199_v24 = vsel %vm137_vm2, %v197_v21, %v198_v22  ;;  %v641_v20 = vstv %s2290_s25  ;;  %s1921_s10 = sld [smem:[#allocation4 + $0x3e]] }
  0x49   :  { %v200_v25 = vsel %vm139_vm3, %v197_v21, %v199_v24  ;;  %s2325_s11 = sld [smem:[#allocation4 + $0xe]] }
  0x4a   :  { %v201_v26 = vsel %vm141_vm4, %v197_v21, %v200_v25  ;;  %s1922_s13 = sld [smem:[#allocation4 + $0x3f]] }
  0x4b   :  { %v203_v27 = vmax.f32 %v146_v23, %v201_v26  ;;  %v666_v26 = vstv %s1868_s27  ;;  %s2332_s15 = sld [smem:[#allocation4 + $0xf]]  ;;  %s2146_s27 = smov 30  }
  0x4c   :  { %s2334_s16 = sld [smem:[#allocation4 + $0x40]] }
  0x4d   :  { %204 = vst [vmem:[#allocation3] sm:$0xf] %v203_v27  ;;  %v668_v27 = vstv %s2296_s28  ;;  %s2340_s18 = sld [smem:[#allocation4 + $0x10]]  ;;  %s2147_s28 = smov 29  }
  0x4e   :  { %s2342_s19 = sld [smem:[#allocation4 + $0x41]] }
  0x4f   :  { %v208_v28 = vld [vmem:[#allocation2] sm:$0xf]  ;;  %s1876_s22 = sld [smem:[#allocation4 + $0x11]] }
  0x50   :  { %v2252_v29 = vmul.f32 0.25, %v208_v28  ;;  %s2359_s24 = sld [smem:[#allocation4 + $0x15]] }
  0x51   :  { %s2361_s25 = sld [smem:[#allocation4 + $0x46]] }
  0x52   :  { %v374_v36 = vmul.f32 %v373_v30, %v2252_v29  ;;  %v336_v37 = vmul.f32 %v335_v31, %v2252_v29  ;;  %v412_v38 = vmul.f32 %v411_v32, %v2252_v29  ;;  %v450_v45 = vmul.f32 %v449_v39, %v2252_v29 }
  0x53   :  { %v488_v55 = vmul.f32 %v487_v46, %v2252_v29  ;;  %v526_v62 = vmul.f32 %v525_v57, %v2252_v29  ;;  %v564_v6 = vmul.f32 %v563_v0, %v2252_v29  ;;  %v615_v13 = vmul.f32 %v614_v8, %v2252_v29 }
  0x54   :  { %v2262_v40 = vld [vmem:[#allocation3] sm:$0xf]  ;;  %v640_v22 = vmul.f32 %v639_v18, %v2252_v29  ;;  %v667_v30 = vmul.f32 %v666_v26, %v2252_v29  ;;  %v747_v46 = vstv %s2312_s1  ;;  %s2149_s1 = smov 18  }
  0x55   :  { %v376_v42 = vmul.f32 %v375_v33, %v2262_v40  ;;  %v338_v43 = vmul.f32 %v337_v34, %v2262_v40  ;;  %v414_v44 = vmul.f32 %v413_v35, %v2262_v40  ;;  %v452_v51 = vmul.f32 %v451_v41, %v2262_v40 }
  0x56   :  { %v490_v56 = vmul.f32 %v489_v47, %v2262_v40  ;;  %v528_v63 = vmul.f32 %v527_v61, %v2262_v40  ;;  %v566_v7 = vmul.f32 %v565_v5, %v2262_v40  ;;  %v617_v14 = vmul.f32 %v616_v12, %v2262_v40 }
  0x57   :  { %v377_v48 = vadd.f32 %v376_v42, %v374_v36  ;;  %v339_v49 = vadd.f32 %v338_v43, %v336_v37  ;;  %v415_v50 = vadd.f32 %v414_v44, %v412_v38  ;;  %v453_v60 = vadd.f32 %v452_v51, %v450_v45 }
  0x58   :  { %v491_v4 = vadd.f32 %v490_v56, %v488_v55  ;;  %v529_v11 = vadd.f32 %v528_v63, %v526_v62  ;;  %v567_v17 = vadd.f32 %v566_v7, %v564_v6  ;;  %v618_v21 = vadd.f32 %v617_v14, %v615_v13 }
  0x59   :  { %v385_v52 = vrot.slane %v377_v48, %v2232_v54  ;;  %v2275_v53 = vrot.slane %v339_v49, %v2232_v54  ;;  %v423_v59 = vrot.slane %v415_v50, %v2232_v54  ;;  %v461_v3 = vrot.slane %v453_v60, %v2232_v54 }
  0x5a   :  { %v499_v10 = vrot.slane %v491_v4, %v2232_v54  ;;  %v537_v16 = vrot.slane %v529_v11, %v2232_v54  ;;  %v575_v24 = vrot.slane %v567_v17, %v2232_v54  ;;  %v642_v25 = vmul.f32 %v641_v20, %v2262_v40 }
  0x5b   :  { %389 = vrot.lane.b32.xlu1 %v385_v52, %s2134_s20  ;;  %v386_v58 = vcombine.high %v385_v52, %v385_v52  ;;  %351 = vrot.lane.b32.xlu0 %v2275_v53, %s2135_s21  ;;  %v424_v1 = vcombine.high %v423_v59, %v423_v59  ;;  %v462_v9 = vcombine.high %v461_v3, %v461_v3  ;;  %v693_v34 = vstv %s1869_s2  ;;  %s2374_s2 = sld [smem:[#allocation4 + $0x47]] }
  0x5c   :  { %v500_v15 = vcombine.high %v499_v10, %v499_v10  ;;  %v538_v23 = vcombine.high %v537_v16, %v537_v16  ;;  %v626_v28 = vrot.slane %v618_v21, %v2232_v54  ;;  %v576_v31 = vcombine.high %v575_v24, %v575_v24 }
  0x5d   :  { %v643_v32 = vadd.f32 %v642_v25, %v640_v22  ;;  %v669_v33 = vmul.f32 %v668_v27, %v2262_v40  ;;  %v695_v35 = vstv %s2302_s0  ;;  %v694_v37 = vmul.f32 %v693_v34, %v2252_v29  ;;  %s2148_s0 = smov 19  }
  0x5e   :  { %v627_v36 = vcombine.high %v626_v28, %v626_v28  ;;  %v720_v38 = vstv %s2305_s30  ;;  %v696_v42 = vmul.f32 %v695_v35, %v2262_v40  ;;  %v722_v43 = vstv %s1919_s6  ;;  %s1882_s30 = sld [smem:[#allocation4 + $0x17]] }
  0x5f   :  { %391 = vrot.lane.b32.xlu1 %v386_v58, %s2134_s20  ;;  %427 = vrot.lane.b32.xlu0 %v423_v59, %s2136_s23  ;;  %v651_v39 = vrot.slane %v643_v32, %v2232_v54  ;;  %v670_v41 = vadd.f32 %v669_v33, %v667_v30  ;;  %v721_v44 = vmul.f32 %v720_v38, %v2252_v29  ;;  %v749_v50 = vstv %s1920_s7  ;;  %s2145_s20 = smov 31   ;;  %s2386_s6 = sld [smem:[#allocation4 + $0x1c]] }
  0x60   :  { %v723_v45 = vmul.f32 %v722_v43, %v2262_v40  ;;  %v697_v49 = vadd.f32 %v696_v42, %v694_v37  ;;  %v748_v51 = vmul.f32 %v747_v46, %v2252_v29  ;;  %v750_v52 = vmul.f32 %v749_v50, %v2262_v40  ;;  %s2391_s7 = sld [smem:[#allocation4 + $0x1d]] }
  0x61   :  { %v652_v47 = vcombine.high %v651_v39, %v651_v39  ;;  %v678_v48 = vrot.slane %v670_v41, %v2232_v54  ;;  %v774_v55 = vstv %s2318_s8  ;;  %v776_v59 = vstv %s1921_s10  ;;  %s2150_s8 = smov 17   ;;  %s2151_s10 = smov 16  }
  0x62   :  { %v705_v57 = vrot.slane %v697_v49, %v2232_v54  ;;  %v724_v58 = vadd.f32 %v723_v45, %v721_v44  ;;  %v775_v60 = vmul.f32 %v774_v55, %v2252_v29  ;;  %v777_v61 = vmul.f32 %v776_v59, %v2262_v40 }
  0x63   :  { %429 = vrot.lane.b32.xlu1 %v424_v1, %s2136_s23  ;;  %465 = vrot.lane.b32.xlu0 %v461_v3, %s2137_s26  ;;  %v679_v56 = vcombine.high %v678_v48, %v678_v48  ;;  %v816_v62 = vstv %s2325_s11  ;;  %v751_v1 = vadd.f32 %v750_v52, %v748_v51  ;;  %v818_v3 = vstv %s1922_s13  ;;  %s2351_s23 = sld [smem:[#allocation4 + $0x42]]  ;;  %s2152_s13 = smov 3  }
  0x64   :  { %v706_v63 = vcombine.high %v705_v57, %v705_v57  ;;  %v732_v0 = vrot.slane %v724_v58, %v2232_v54  ;;  %v778_v4 = vadd.f32 %v777_v61, %v775_v60  ;;  %v817_v5 = vmul.f32 %v816_v62, %v2252_v29  ;;  %s1889_s11 = sld [smem:[#allocation4 + $0x1e]] }
  0x65   :  { %v819_v6 = vmul.f32 %v818_v3, %v2262_v40  ;;  %v348_v7 = vcombine.high %v2275_v53, %v2275_v53  ;;  %v843_v11 = vstv %s2334_s16  ;;  %v870_v17 = vstv %s2342_s19  ;;  %s2411_s16 = sld [smem:[#allocation4 + $0x54]] }
  0x66   :  { %v733_v8 = vcombine.high %v732_v0, %v732_v0  ;;  %v786_v12 = vrot.slane %v778_v4, %v2232_v54  ;;  %v1018_v32 = vstv %s2359_s24  ;;  %v1020_v33 = vstv %s2361_s25  ;;  %s2417_s19 = sld [smem:[#allocation4 + $0x55]]  ;;  %s2156_s25 = smov 115  }
  0x67   :  { %467 = vrot.lane.b32.xlu1 %v462_v9, %s2137_s26  ;;  %503 = vrot.lane.b32.xlu0 %v499_v10, %s2138_s29  ;;  %v759_v9 = vrot.slane %v751_v1, %v2232_v54  ;;  %v841_v10 = vstv %s2332_s15  ;;  %v820_v13 = vadd.f32 %v819_v6, %v817_v5  ;;  %s2364_s26 = sld [smem:[#allocation4 + $0x12]]  ;;  %v1021_v41 = vmul.f32 %v1020_v33, %v2262_v40 }
  0x68   :  { %v842_v14 = vmul.f32 %v841_v10, %v2252_v29  ;;  %v787_v18 = vcombine.high %v786_v12, %v786_v12  ;;  %v1070_v55 = vstv %s1882_s30  ;;  %v1213_v62 = vstv %s2386_s6  ;;  %s1894_s15 = sld [smem:[#allocation4 + $0x23]] }
  0x69   :  { %v760_v53 = vcombine.high %v759_v9, %v759_v9  ;;  %v828_v20 = vrot.slane %v820_v13, %v2232_v54  ;;  %v897_v25 = vstv %s2351_s23  ;;  %v1071_v59 = vmul.f32 %v1070_v55, %v2252_v29  ;;  %s1927_s23 = sld [smem:[#allocation4 + $0x44]] }
  0x6a   :  { %v1214_v1 = vmul.f32 %v1213_v62, %v2252_v29  ;;  %v1238_v6 = vstv %s2391_s7  ;;  %v1265_v13 = vstv %s1889_s11  ;;  %s2427_s24 = sld [smem:[#allocation4 + $0x19]] }
  0x6b   :  { %505 = vrot.lane.b32.xlu1 %v500_v15, %s2138_s29  ;;  %541 = vrot.lane.b32.xlu0 %v537_v16, %s2139_s5  ;;  %v844_v15 = vmul.f32 %v843_v11, %v2262_v40  ;;  %v868_v16 = vstv %s2340_s18  ;;  %v829_v26 = vcombine.high %v828_v20, %v828_v20  ;;  %s2372_s29 = sld [smem:[#allocation4 + $0x16]] }
  0x6c   :  { %v869_v22 = vmul.f32 %v868_v16, %v2252_v29  ;;  %s1895_s18 = sld [smem:[#allocation4 + $0x24]] }
  0x6d   :  { %v845_v21 = vadd.f32 %v844_v15, %v842_v14  ;;  %v922_v34 = vstv %s2364_s26  ;;  %v1266_v15 = vmul.f32 %v1265_v13, %v2252_v29  ;;  %s1933_s26 = sld [smem:[#allocation4 + $0x4a]] }
  0x6e   :  { %v923_v42 = vmul.f32 %v922_v34, %v2252_v29  ;;  %s1901_s30 = sld [smem:[#allocation4 + $0x2a]] }
  0x6f   :  { %543 = vrot.lane.b32.xlu1 %v538_v23, %s2139_s5  ;;  %579 = vrot.lane.b32.xlu0 %v575_v24, %s2140_s3  ;;  %v871_v23 = vmul.f32 %v870_v17, %v2262_v40  ;;  %v895_v24 = vstv %s1876_s22  ;;  %s2380_s5 = sld [smem:[#allocation4 + $0x48]]  ;;  %s2155_s22 = smov 1  }
  0x70   :  { %v896_v27 = vmul.f32 %v895_v24, %v2252_v29  ;;  %s2456_s6 = sld [smem:[#allocation4 + $0x2b]] }
  0x71   :  { %v872_v30 = vadd.f32 %v871_v23, %v869_v22  ;;  %v1043_v46 = vstv %s2372_s29  ;;  %s2444_s29 = sld [smem:[#allocation4 + $0x25]] }
  0x72   :  { %v1044_v51 = vmul.f32 %v1043_v46, %v2252_v29  ;;  %s2462_s7 = sld [smem:[#allocation4 + $0x14]] }
  0x73   :  { %581 = vrot.lane.b32.xlu1 %v576_v31, %s2140_s3  ;;  %630 = vrot.lane.b32.xlu0 %v626_v28, %s2141_s9  ;;  %v853_v28 = vrot.slane %v845_v21, %v2232_v54  ;;  %v898_v31 = vmul.f32 %v897_v25, %v2262_v40  ;;  %s1936_s3 = sld [smem:[#allocation4 + $0x4d]]  ;;  %v1417_v21 = vstv %s2411_s16 }
  0x74   :  { %s2473_s11 = sld [smem:[#allocation4 + $0x1a]] }
  0x75   :  { %v854_v35 = vcombine.high %v853_v28, %v853_v28  ;;  %v899_v37 = vadd.f32 %v898_v31, %v896_v27  ;;  %v1440_v27 = vstv %s1895_s18  ;;  %s2489_s16 = sld [smem:[#allocation4 + $0x26]]  ;;  %s2163_s18 = smov 112  }
  0x77   :  { %632 = vrot.lane.b32.xlu1 %v627_v36, %s2141_s9  ;;  %655 = vrot.lane.b32.xlu0 %v651_v39, %s2142_s12  ;;  %v880_v36 = vrot.slane %v872_v30, %v2232_v54  ;;  %v1019_v39 = vmul.f32 %v1018_v32, %v2252_v29  ;;  %v907_v45 = vrot.slane %v899_v37, %v2232_v54  ;;  %s1937_s9 = sld [smem:[#allocation4 + $0x4e]]  ;;  %v951_v37 = vstv %s1927_s23 }
  0x78   :  { %v1441_v32 = vmul.f32 %v1440_v27, %v2252_v29  ;;  %s2512_s23 = sld [smem:[#allocation4 + $0x4c]] }
  0x79   :  { %v881_v44 = vcombine.high %v880_v36, %v880_v36  ;;  %v908_v50 = vcombine.high %v907_v45, %v907_v45 }
  0x7a   :  { %v1144_v27 = vstv %s2473_s11  ;;  %s2679_s11 = sld [smem:[#allocation4 + $0x29]] }
  0x7b   :  { %657 = vrot.lane.b32.xlu1 %v652_v47, %s2142_s12  ;;  %682 = vrot.lane.b32.xlu0 %v678_v48, %s2143_s14  ;;  %v1045_v47 = vstv %s2374_s2  ;;  %v1022_v48 = vadd.f32 %v1021_v41, %v1019_v39  ;;  %s2403_s12 = sld [smem:[#allocation4 + $0x4f]]  ;;  %v952_v39 = vmul.f32 %v951_v37, %v2262_v40  ;;  %v1117_v41 = vstv %s2427_s24  ;;  %s2164_s24 = smov 97  }
  0x7c   :  { %v1046_v52 = vmul.f32 %v1045_v47, %v2262_v40  ;;  %s2446_s2 = sld [smem:[#allocation4 + $0x56]]  ;;  %v1118_v47 = vmul.f32 %v1117_v41, %v2252_v29  ;;  %v1145_v37 = vmul.f32 %v1144_v27, %v2252_v29  ;;  %v332_v27 = vld [vmem:[#allocation9 + $0x5] ss:$8 sm:$0x3] }
  0x7e   :  { %v1047_v60 = vadd.f32 %v1046_v52, %v1044_v51 }
  0x7f   :  { %684 = vrot.lane.b32.xlu1 %v679_v56, %s2143_s14  ;;  %709 = vrot.lane.b32.xlu0 %v705_v57, %s2144_s17  ;;  %v1072_v56 = vstv %s2380_s5  ;;  %v1030_v57 = vrot.slane %v1022_v48, %v2232_v54  ;;  %s2153_s14 = smov 15   ;;  %s2452_s5 = sld [smem:[#allocation4 + $0x5b]] }
  0x80   :  { %v1073_v61 = vmul.f32 %v1072_v56, %v2262_v40  ;;  %v1055_v4 = vrot.slane %v1047_v60, %v2232_v54  ;;  %v1467_v60 = vstv %s2444_s29  ;;  %s2563_s29 = sld [smem:[#allocation4 + $0x58]] }
  0x82   :  { %v1074_v5 = vadd.f32 %v1073_v61, %v1071_v59  ;;  %v1056_v11 = vcombine.high %v1055_v4, %v1055_v4  ;;  %v1469_v61 = vstv %s2446_s2  ;;  %s2570_s2 = sld [smem:[#allocation4 + $0x2d]] }
  0x83   :  { %711 = vrot.lane.b32.xlu1 %v706_v63, %s2144_s17  ;;  %736 = vrot.lane.b32.xlu0 %v732_v0, %s2145_s20  ;;  %v1215_v63 = vstv %s1936_s3  ;;  %v1031_v0 = vcombine.high %v1030_v57, %v1030_v57  ;;  %s2154_s17 = smov 2   ;;  %s1951_s3 = sld [smem:[#allocation4 + $0x5c]] }
  0x84   :  { %v1216_v3 = vmul.f32 %v1215_v63, %v2262_v40  ;;  %v1082_v10 = vrot.slane %v1074_v5, %v2232_v54 }
  0x85   :  { %v1619_v5 = vstv %s2452_s5  ;;  %s2167_s5 = smov 13  }
  0x86   :  { %v1083_v17 = vcombine.high %v1082_v10, %v1082_v10 }
  0x87   :  { %738 = vrot.lane.b32.xlu1 %v733_v8, %s2145_s20  ;;  %353 = vrot.lane.b32.xlu0 %v348_v7, %s2135_s21  ;;  %s1926_s21 = sld [smem:[#allocation4 + $0x43]]  ;;  %v1240_v7 = vstv %s1937_s9  ;;  %v1239_v8 = vmul.f32 %v1238_v6, %v2252_v29 }
  0x88   :  { %s2420_s20 = sld [smem:[#allocation4 + $0x13]] }
  0x89   :  { %s2466_s9 = sld [smem:[#allocation4 + $0x45]] }
  0x8b   :  { %765 = vrot.lane.b32.xlu1 %v760_v53, %s2146_s27  ;;  %763 = vrot.lane.b32.xlu0 %v759_v9, %s2146_s27  ;;  %v1241_v9 = vmul.f32 %v1240_v7, %v2262_v40  ;;  %v1267_v53 = vstv %s2403_s12  ;;  %s2435_s27 = sld [smem:[#allocation4 + $0x1f]] }
  0x8c   :  { %s2475_s12 = sld [smem:[#allocation4 + $0x4b]] }
  0x8d   :  { %v924_v38 = vstv %s1926_s21  ;;  %v1242_v14 = vadd.f32 %v1241_v9, %v1239_v8  ;;  %s2157_s21 = smov 114  }
  0x8e   :  { %v925_v43 = vmul.f32 %v924_v38, %v2262_v40  ;;  %v949_v33 = vstv %s2420_s20  ;;  %s2503_s20 = sld [smem:[#allocation4 + $0x5d]] }
  0x8f   :  { %792 = vrot.lane.b32.xlu1 %v787_v18, %s2147_s28  ;;  %790 = vrot.lane.b32.xlu0 %v786_v12, %s2147_s28  ;;  %v1217_v12 = vadd.f32 %v1216_v3, %v1214_v1  ;;  %v1268_v18 = vmul.f32 %v1267_v53, %v2262_v40  ;;  %v1250_v22 = vrot.slane %v1242_v14, %v2232_v54  ;;  %s1939_s28 = sld [smem:[#allocation4 + $0x50]]  ;;  %v2478_v53 = vand.u32 127, %v118_v2 }
  0x90   :  { %v926_v49 = vadd.f32 %v925_v43, %v923_v42  ;;  %v950_v38 = vmul.f32 %v949_v33, %v2252_v29  ;;  %v1468_v1 = vmul.f32 %v1467_v60, %v2252_v29  ;;  %v1470_v3 = vmul.f32 %v1469_v61, %v2262_v40  ;;  %v326_v61 = vld [vmem:[#allocation9 + $0x2] ss:$8 sm:$0x3] }
  0x91   :  { %v1225_v16 = vrot.slane %v1217_v12, %v2232_v54  ;;  %v1269_v25 = vadd.f32 %v1268_v18, %v1266_v15  ;;  %v1251_v31 = vcombine.high %v1250_v22, %v1250_v22  ;;  %v1292_v51 = vstv %s2435_s27  ;;  %s2165_s27 = smov 83  }
  0x92   :  { %v2398_v58 = vrot.slane %v926_v49, %v2232_v54  ;;  %v953_v46 = vadd.f32 %v952_v39, %v950_v38  ;;  %v1293_v56 = vmul.f32 %v1292_v51, %v2252_v29  ;;  %v1471_v9 = vadd.f32 %v1470_v3, %v1468_v1 }
  0x93   :  { %834 = vrot.lane.b32.xlu1 %v829_v26, %s2148_s0  ;;  %832 = vrot.lane.b32.xlu0 %v828_v20, %s2148_s0  ;;  %v1415_v20 = vstv %s1894_s15  ;;  %v1226_v24 = vcombine.high %v1225_v16, %v1225_v16  ;;  %v1418_v26 = vmul.f32 %v1417_v21, %v2262_v40  ;;  %v1277_v34 = vrot.slane %v1269_v25, %v2232_v54  ;;  %s2158_s0 = smov 113   ;;  %s2487_s15 = sld [smem:[#allocation4 + $0x51]] }
  0x94   :  { %v1416_v23 = vmul.f32 %v1415_v20, %v2252_v29  ;;  %v935_v30 = vcombine.high %v2398_v58, %v2398_v58  ;;  %v961_v59 = vrot.slane %v953_v46, %v2232_v54  ;;  %v1644_v12 = vstv %s1951_s3  ;;  %s2615_s3 = sld [smem:[#allocation4 + $0x59]] }
  0x95   :  { %v1278_v42 = vcombine.high %v1277_v34, %v1277_v34  ;;  %v1294_v52 = vstv %s1939_s28  ;;  %v1645_v15 = vmul.f32 %v1644_v12, %v2262_v40  ;;  %v976_v18 = vstv %s2462_s7  ;;  %s2166_s28 = smov 82   ;;  %s2168_s7 = smov 126  }
  0x96   :  { %v978_v20 = vstv %s2466_s9  ;;  %vm393_vm5 = vcmp.lt.s32.totalorder %v2478_v53, 50  ;;  %vm431_vm6 = vcmp.lt.s32.totalorder %v2478_v53, 49  ;;  %v1494_v46 = vstv %s2489_s16  ;;  %s2652_s9 = sld [smem:[#allocation4 + $0x5f]]  ;;  %s2171_s16 = smov 81  }
  0x97   :  { %859 = vrot.lane.b32.xlu1 %v854_v35, %s2149_s1  ;;  %857 = vrot.lane.b32.xlu0 %v853_v28, %s2149_s1  ;;  %v1442_v28 = vstv %s2417_s19  ;;  %v1419_v35 = vadd.f32 %v1418_v26, %v1416_v23  ;;  %s2159_s1 = smov 99   ;;  %v977_v23 = vmul.f32 %v976_v18, %v2252_v29  ;;  %s2499_s19 = sld [smem:[#allocation4 + $0x2c]]  ;;  %vm469_vm7 = vcmp.lt.s32.totalorder %v2478_v53, 48 }
  0x98   :  { %v1671_v1 = vstv %s2503_s20  ;;  %vm507_vm8 = vcmp.lt.s32.totalorder %v2478_v53, 47  ;;  %vm545_vm9 = vcmp.lt.s32.totalorder %v2478_v53, 46  ;;  %vm583_vm10 = vcmp.lt.s32.totalorder %v2478_v53, 45  ;;  %s2780_s20 = sld [smem:[#allocation4 + $0x61]] }
  0x99   :  { %v1427_v43 = vrot.slane %v1419_v35, %v2232_v54  ;;  %v1321_v41 = vstv %s2487_s15  ;;  %vm634_vm11 = vcmp.lt.s32.totalorder %v2478_v53, 35  ;;  %vm659_vm12 = vcmp.lt.s32.totalorder %v2478_v53, 34  ;;  %s2717_s15 = sld [smem:[#allocation4 + $0x60]] }
  0x9a   :  { %vm686_vm13 = vcmp.lt.s32.totalorder %v2478_v53, 33  ;;  %vm713_vm14 = vcmp.lt.s32.totalorder %v2478_v53, 32  ;;  %vm740_vm15 = vcmp.lt.s32.totalorder %v2478_v53, 31  ;;  %vm357_vm0 = vcmp.lt.s32.totalorder %v2478_v53, 51 }
  0x9b   :  { %886 = vrot.lane.b32.xlu1 %v881_v44, %s2150_s8  ;;  %884 = vrot.lane.b32.xlu0 %v880_v36, %s2150_s8  ;;  %v1443_v36 = vmul.f32 %v1442_v28, %v2262_v40  ;;  %v1428_v49 = vcombine.high %v1427_v43, %v1427_v43  ;;  %s2160_s8 = smov 98   ;;  %v1146_v28 = vstv %s2475_s12  ;;  %s2687_s12 = sld [smem:[#allocation4 + $0x5a]]  ;;  %vm767_vm1 = vcmp.lt.s32.totalorder %v2478_v53, 30 }
  0x9c   :  { %v1147_v38 = vmul.f32 %v1146_v28, %v2262_v40  ;;  %vm794_vm2 = vcmp.lt.s32.totalorder %v2478_v53, 29  ;;  %vm836_vm3 = vcmp.lt.s32.totalorder %v2478_v53, 19  ;;  %vm861_vm4 = vcmp.lt.s32.totalorder %v2478_v53, 18 }
  0x9d   :  { %v1444_v44 = vadd.f32 %v1443_v36, %v1441_v32 }
  0x9f   :  { %913 = vrot.lane.b32.xlu1 %v908_v50, %s2151_s10  ;;  %911 = vrot.lane.b32.xlu0 %v907_v45, %s2151_s10  ;;  %v1119_v45 = vstv %s1933_s26  ;;  %v1452_v50 = vrot.slane %v1444_v44, %v2232_v54  ;;  %s2161_s10 = smov 14   ;;  %s2529_s26 = sld [smem:[#allocation4 + $0x52]] }
  0xa0   :  { %v1120_v48 = vmul.f32 %v1119_v45, %v2262_v40 }
  0xa2   :  { %v1121_v55 = vadd.f32 %v1120_v48, %v1118_v47  ;;  %v324_v48 = vld [vmem:[#allocation9 + $0x1] ss:$8 sm:$0x3] }
  0xa3   :  { %1034 = vrot.lane.b32.xlu1 %v1030_v57, %s2152_s13  ;;  %938 = vrot.lane.b32.xlu0 %v2398_v58, %s2153_s14  ;;  %v1295_v57 = vmul.f32 %v1294_v52, %v2262_v40  ;;  %v1453_v58 = vcombine.high %v1452_v50, %v1452_v50  ;;  %v1148_v52 = vadd.f32 %v1147_v38, %v1145_v37 }
  0xa4   :  { %v1129_v62 = vrot.slane %v1121_v55, %v2232_v54 }
  0xa5   :  { %v1296_v63 = vadd.f32 %v1295_v57, %v1293_v56  ;;  %v1322_v56 = vmul.f32 %v1321_v41, %v2262_v40  ;;  %v1495_v57 = vmul.f32 %v1494_v46, %v2252_v29 }
  0xa6   :  { %v1130_v6 = vcombine.high %v1129_v62, %v1129_v62 }
  0xa7   :  { %1059 = vrot.lane.b32.xlu1 %v1055_v4, %s2154_s17  ;;  %1036 = vrot.lane.b32.xlu0 %v1031_v0, %s2152_s13  ;;  %v962_v0 = vcombine.high %v961_v59, %v961_v59  ;;  %v1617_v4 = vstv %s1901_s30  ;;  %v1304_v7 = vrot.slane %v1296_v63, %v2232_v54  ;;  %s2482_s13 = sld [smem:[#allocation4 + $0x20]] }
  0xa8   :  { %v1618_v8 = vmul.f32 %v1617_v4, %v2252_v29  ;;  %s2592_s30 = sld [smem:[#allocation4 + $0x22]] }
  0xa9   :  { %v1305_v13 = vcombine.high %v1304_v7, %v1304_v7 }
  0xab   :  { %1086 = vrot.lane.b32.xlu1 %v1082_v10, %s2155_s22  ;;  %1061 = vrot.lane.b32.xlu0 %v1056_v11, %s2154_s17  ;;  %v1620_v10 = vmul.f32 %v1619_v5, %v2262_v40  ;;  %v1642_v11 = vstv %s2456_s6  ;;  %s2493_s17 = sld [smem:[#allocation4 + $0x57]] }
  0xac   :  { %v1643_v14 = vmul.f32 %v1642_v11, %v2252_v29  ;;  %s2599_s6 = sld [smem:[#allocation4 + $0x53]] }
  0xad   :  { %v1319_v39 = vstv %s2482_s13  ;;  %s2170_s13 = smov 96  }
  0xae   :  { %v1320_v55 = vmul.f32 %v1319_v39, %v2252_v29 }
  0xaf   :  { %1229 = vrot.lane.b32.xlu1 %v1225_v16, %s2156_s25  ;;  %1088 = vrot.lane.b32.xlu0 %v1083_v17, %s2155_s22  ;;  %v1479_v16 = vrot.slane %v1471_v9, %v2232_v54  ;;  %v1621_v17 = vadd.f32 %v1620_v10, %v1618_v8  ;;  %s2505_s22 = sld [smem:[#allocation4 + $0x1b]]  ;;  %v1156_v9 = vrot.slane %v1148_v52, %v2232_v54 }
  0xb0   :  { %v1323_v10 = vadd.f32 %v1322_v56, %v1320_v55 }
  0xb1   :  { %v1480_v25 = vcombine.high %v1479_v16, %v1479_v16  ;;  %v1629_v26 = vrot.slane %v1621_v17, %v2232_v54  ;;  %v1496_v47 = vstv %s2493_s17  ;;  %s2725_s17 = sld [smem:[#allocation4 + $0x30]] }
  0xb3   :  { %1254 = vrot.lane.b32.xlu1 %v1250_v22, %s2157_s21  ;;  %1231 = vrot.lane.b32.xlu0 %v1226_v24, %s2156_s25  ;;  %v1646_v22 = vadd.f32 %v1645_v15, %v1643_v14  ;;  %v979_v24 = vmul.f32 %v978_v20, %v2262_v40  ;;  %v1630_v36 = vcombine.high %v1629_v26, %v1629_v26  ;;  %s2519_s25 = sld [smem:[#allocation4 + $0x21]]  ;;  %v330_v15 = vld [vmem:[#allocation9 + $0x4] ss:$8 sm:$0x3] }
  0xb4   :  { %v1672_v14 = vmul.f32 %v1671_v1, %v2262_v40 }
  0xb5   :  { %v980_v35 = vadd.f32 %v979_v24, %v977_v23  ;;  %v1171_v5 = vstv %s2505_s22  ;;  %s2174_s22 = smov 95  }
  0xb6   :  { %v1172_v18 = vmul.f32 %v1171_v5, %v2252_v29 }
  0xb7   :  { %940 = vrot.lane.b32.xlu1 %v935_v30, %s2153_s14  ;;  %1256 = vrot.lane.b32.xlu0 %v1251_v31, %s2157_s21  ;;  %s2162_s14 = smov 127   ;;  %s2559_s21 = sld [smem:[#allocation4 + $0x27]] }
  0xbb   :  { %1283 = vrot.lane.b32.xlu1 %v1278_v42, %s2158_s0  ;;  %1281 = vrot.lane.b32.xlu0 %v1277_v34, %s2158_s0  ;;  %v1654_v34 = vrot.slane %v1646_v22, %v2232_v54  ;;  %v2522_v42 = vsub.s32 0, %v2225_v19  ;;  %v1348_v22 = vstv %s2529_s26  ;;  %s2576_s0 = sld [smem:[#allocation4 + $0x5e]]  ;;  %s2178_s26 = smov 79  }
  0xbc   :  { %v1349_v39 = vmul.f32 %v1348_v22, %v2262_v40 }
  0xbd   :  { %v1655_v51 = vcombine.high %v1654_v34, %v1654_v34  ;;  %v2566_v11 = vrot.slane %v326_v61, %v2522_v42 }
  0xbf   :  { %1433 = vrot.lane.b32.xlu1 %v1428_v49, %s2159_s1  ;;  %1431 = vrot.lane.b32.xlu0 %v1427_v43, %s2159_s1  ;;  %v2525_v43 = vsub.s32 1, %v2225_v19  ;;  %v988_v19 = vrot.slane %v980_v35, %v2232_v54  ;;  %v2602_v35 = vrot.slane %v330_v15, %v2522_v42  ;;  %s2606_s1 = sld [smem:[#allocation4 + $0x28]] }
  0xc1   :  { %v2549_v60 = vrot.slane %v324_v48, %v2525_v43  ;;  %v989_v8 = vcombine.high %v988_v19, %v988_v19  ;;  %v2579_v23 = vrot.slane %v326_v61, %v2525_v43  ;;  %v2609_v41 = vrot.slane %v330_v15, %v2525_v43 }
  0xc3   :  { %1458 = vrot.lane.b32.xlu1 %v1453_v58, %s2160_s8  ;;  %1456 = vrot.lane.b32.xlu0 %v1452_v50, %s2160_s8  ;;  %v1497_v58 = vmul.f32 %v1496_v47, %v2262_v40  ;;  %s2643_s8 = sld [smem:[#allocation4 + $0x2e]] }
  0xc5   :  { %v1498_v12 = vadd.f32 %v1497_v58, %v1495_v57 }
  0xc7   :  { %967 = vrot.lane.b32.xlu1 %v962_v0, %s2161_s10  ;;  %965 = vrot.lane.b32.xlu0 %v961_v59, %s2161_s10  ;;  %v2546_v59 = vrot.slane %v324_v48, %v2522_v42  ;;  %v1669_v0 = vstv %s2499_s19  ;;  %v1506_v47 = vrot.slane %v1498_v12, %v2232_v54  ;;  %v1698_v12 = vstv %s2576_s0  ;;  %s2169_s10 = smov 111   ;;  %s2173_s19 = smov 110  }
  0xc8   :  { %s2182_s0 = smov [#allocation12]  }
  0xcb   :  { %1135 = vrot.lane.b32.xlu1 %v1130_v6, %s2162_s14  ;;  %1133 = vrot.lane.b32.xlu0 %v1129_v62, %s2162_s14  ;;  %v1173_v6 = vstv %s2512_s23  ;;  %s2710_s14 = sld [smem:[#allocation4 + $0x2f]]  ;;  %s2175_s23 = smov 80  }
  0xcc   :  { %v1174_v20 = vmul.f32 %v1173_v6, %v2262_v40  ;;  %v1507_v6 = vcombine.high %v1506_v47, %v1506_v47 }
  0xcd   :  { %v390_v2 = vpop.permute.xlu1 %389  ;;  %v2491_v21 = vpop.permute.xlu0 %351 }
  0xce   :  { %v1175_v48 = vadd.f32 %v1174_v20, %v1172_v18  ;;  %v1375_v18 = vstv %s2599_s6 }
  0xcf   :  { %1310 = vrot.lane.b32.xlu1 %v1305_v13, %s2163_s18  ;;  %1308 = vrot.lane.b32.xlu0 %v1304_v7, %s2163_s18  ;;  %v328_v7 = vld [vmem:[#allocation9 + $0x3] ss:$8 sm:$0x3]  ;;  %v1670_v13 = vmul.f32 %v1669_v0, %v2252_v29  ;;  %s2172_s18 = smov 125  }
  0xd0   :  { %v2582_v24 = vrot.slane %v328_v7, %v2522_v42  ;;  %v2595_v28 = vrot.slane %v328_v7, %v2525_v43  ;;  %v2650_v7 = vrot.slane %v1175_v48, %v2232_v54 }
  0xd1   :  { %v392_v30 = vpop.permute.xlu1 %391  ;;  %v428_v31 = vpop.permute.xlu0 %427  ;;  %v1673_v37 = vadd.f32 %v1672_v14, %v1670_v13  ;;  %v2665_v14 = vld [vmem:[#allocation3] sm:$0xf] }
  0xd2   :  { %v2507_v32 = vsel %vm393_vm5, %v390_v2, %v392_v30  ;;  %v2509_v33 = vsel %vm393_vm5, %v392_v30, %v390_v2  ;;  %v1346_v2 = vstv %s2519_s25  ;;  %v1157_v30 = vcombine.high %v1156_v9, %v1156_v9  ;;  %s2177_s25 = smov 94  }
  0xd3   :  { %1485 = vrot.lane.b32.xlu1 %v1480_v25, %s2164_s24  ;;  %1483 = vrot.lane.b32.xlu0 %v1479_v16, %s2164_s24  ;;  %v1347_v38 = vmul.f32 %v1346_v2, %v2252_v29  ;;  %v2639_v58 = vrot.slane %v1673_v37, %v2232_v54  ;;  %v1550_v37 = vstv %s2615_s3  ;;  %v1184_v48 = vcombine.high %v2650_v7, %v2650_v7  ;;  %s2176_s24 = smov 109  }
  0xd4   :  { %vm888_vm5 = vcmp.lt.s32.totalorder %v2478_v53, 17 }
  0xd5   :  { %v430_v44 = vpop.permute.xlu1 %429  ;;  %v466_v45 = vpop.permute.xlu0 %465  ;;  %v1350_v61 = vadd.f32 %v1349_v39, %v1347_v38  ;;  %v1682_v20 = vcombine.high %v2639_v58, %v2639_v58 }
  0xd6   :  { %v2533_v49 = vsel %vm431_vm6, %v428_v31, %v430_v44  ;;  %v2537_v50 = vsel %vm431_vm6, %v430_v44, %v428_v31  ;;  %v334_v31 = vld [vmem:[#allocation9 + $0x6] ss:$8 sm:$0x3]  ;;  %v2612_v44 = vrot.slane %v332_v27, %v2522_v42  ;;  %vm915_vm6 = vcmp.lt.s32.totalorder %v2478_v53, 16 }
  0xd7   :  { %1635 = vrot.lane.b32.xlu1 %v1630_v36, %s2165_s27  ;;  %1633 = vrot.lane.b32.xlu0 %v1629_v26, %s2165_s27  ;;  %v322_v36 = vld [vmem:[#allocation9] ss:$8 sm:$0x3]  ;;  %v2629_v52 = vrot.slane %v334_v31, %v2522_v42  ;;  %v2633_v55 = vrot.slane %v334_v31, %v2525_v43  ;;  %v2677_v2 = vrot.slane %v1350_v61, %v2232_v54  ;;  %s2179_s27 = smov 93  }
  0xd8   :  { %v2636_v57 = vrot.slane %v322_v36, %v2522_v42  ;;  %v2646_v5 = vrot.slane %v322_v36, %v2525_v43  ;;  %v1699_v31 = vmul.f32 %v2665_v14, %v1698_v12  ;;  %v1548_v36 = vstv %s2606_s1 }
  0xd9   :  { %v468_v62 = vpop.permute.xlu1 %467  ;;  %v504_v63 = vpop.permute.xlu0 %503 }
  0xda   :  { %v2553_v3 = vsel %vm469_vm7, %v466_v45, %v468_v62  ;;  %v2555_v4 = vsel %vm469_vm7, %v468_v62, %v466_v45  ;;  %v1521_v62 = vstv %s2559_s21  ;;  %s2180_s21 = smov 78   ;;  %vm1038_vm7 = vcmp.lt.s32.totalorder %v2478_v53, 3 }
  0xdb   :  { %1660 = vrot.lane.b32.xlu1 %v1655_v51, %s2166_s28  ;;  %1658 = vrot.lane.b32.xlu0 %v1654_v34, %s2166_s28  ;;  %v1331_v34 = vrot.slane %v1323_v10, %v2232_v54  ;;  %v2618_v51 = vrot.slane %v332_v27, %v2525_v43  ;;  %v1696_v10 = vstv %s2570_s2  ;;  %v1522_v13 = vmul.f32 %v1521_v62, %v2252_v29  ;;  %s2181_s28 = smov 77   ;;  %s1932_s2 = sld [smem:[#allocation4 + $0x49]] }
  0xdd   :  { %v506_v16 = vpop.permute.xlu1 %505  ;;  %v542_v17 = vpop.permute.xlu0 %541  ;;  %v1332_v56 = vcombine.high %v1331_v34, %v1331_v34 }
  0xde   :  { %v2586_v25 = vsel %vm507_vm8, %v504_v63, %v506_v16  ;;  %v2590_v26 = vsel %vm507_vm8, %v506_v16, %v504_v63  ;;  %v1523_v63 = vstv %s2563_s29  ;;  %v2668_v16 = vld [vmem:[#allocation8] ss:$8 sm:$0x3]  ;;  %vm1063_vm8 = vcmp.lt.s32.totalorder %v2478_v53, 2  ;;  %s1883_s29 = sld [smem:[#allocation4 + $0x18]] }
  0xdf   :  { %994 = vrot.lane.b32.xlu1 %v989_v8, %s2167_s5  ;;  %992 = vrot.lane.b32.xlu0 %v988_v19, %s2167_s5  ;;  %v1524_v15 = vmul.f32 %v2665_v14, %v1523_v63  ;;  %v605_v61 = vrot.slane %v2668_v16, %v2522_v42 }
  0xe1   :  { %v544_v45 = vpop.permute.xlu1 %543  ;;  %v580_v46 = vpop.permute.xlu0 %579 }
  0xe2   :  { %v2622_v40 = vsel %vm545_vm9, %v542_v17, %v544_v45  ;;  %v2626_v19 = vsel %vm545_vm9, %v544_v45, %v542_v17  ;;  %v1373_v17 = vstv %s2592_s30  ;;  %vm1090_vm9 = vcmp.lt.s32.totalorder %v2478_v53, 1  ;;  %s1849_s30 = sshll.u32 %s2182_s0, 4  ;;  %s1850_s30 = int_to_ptr.vmem [resolvable:$true] %s1849_s30 }
  0xe3   :  { %1162 = vrot.lane.b32.xlu1 %v1157_v30, %s2168_s7  ;;  %1160 = vrot.lane.b32.xlu0 %v1156_v9, %s2168_s7  ;;  %v1697_v30 = vmul.f32 %v1696_v10, %v2252_v29  ;;  %v1374_v45 = vmul.f32 %v1373_v17, %v2252_v29  ;;  %v1359_v10 = vcombine.high %v2677_v2, %v2677_v2  ;;  %s2097_s5 = scalar_lea.vmem %s1850_s30, 64  ;;  %p2102_p2 = scmp.lt.s32.totalorder %s1850_s30, %s1850_s30 }
  0xe4   :  { %p2098_p1 = scmp.ne.s32.totalorder %s1850_s30, %s2097_s5  ;;  %p2103_p3 = scmp.lt.s32.totalorder %s2097_s5, %s2097_s5 }
  0xe5   :  { %v582_v0 = vpop.permute.xlu1 %581  ;;  %v631_v1 = vpop.permute.xlu0 %630  ;;  %v1700_v12 = vadd.f32 %v1699_v31, %v1697_v30 }
  0xe6   :  { %v2656_v8 = vsel %vm583_vm10, %v580_v46, %v582_v0  ;;  %v2660_v9 = vsel %vm583_vm10, %v582_v0, %v580_v46  ;;  %v1376_v46 = vmul.f32 %v2665_v14, %v1375_v18  ;;  %v1549_v0 = vmul.f32 %v1548_v36, %v2252_v29  ;;  %p2104_p4 = por %p2103_p3, %p2102_p2 }
  0xe7   :  { %1337 = vrot.lane.b32.xlu1 %v1332_v56, %s2169_s10  ;;  %1335 = vrot.lane.b32.xlu0 %v1331_v34, %s2169_s10  ;;  %v2683_v34 = vld [vmem:[#allocation8 + $0x1] ss:$8 sm:$0x3]  ;;  %v1525_v56 = vadd.f32 %v1524_v15, %v1522_v13  ;;  %v1723_v13 = vstv %s2643_s8  ;;  %v1725_v15 = vstv %s2652_s9  ;;  %vm1233_vm10 = vcmp.lt.s32.totalorder %v2478_v53, 115 }
  0xe8   :  { %v1377_v36 = vadd.f32 %v1376_v46, %v1374_v45  ;;  %p2105_p5 = pnand %p2104_p4, %p2098_p1 }
  0xe9   :  { %v633_v22 = vpop.permute.xlu1 %632  ;;  %v656_v27 = vpop.permute.xlu0 %655 }
  0xea   :  { %v635_v38 = vsel %vm634_vm11, %v631_v1, %v633_v22  ;;  %v636_v39 = vsel %vm634_vm11, %v633_v22, %v631_v1  ;;  %v1551_v1 = vmul.f32 %v2665_v14, %v1550_v37  ;;  %vm942_vm11 = vcmp.lt.s32.totalorder %v2478_v53, 15 }
  0xeb   :  { %1512 = vrot.lane.b32.xlu1 %v1507_v6, %s2170_s13  ;;  %1510 = vrot.lane.b32.xlu0 %v1506_v47, %s2170_s13  ;;  %v637_v17 = vmul.f32 %v636_v39, %v2636_v57  ;;  %v638_v37 = vmul.f32 %v635_v38, %v2646_v5  ;;  %v1724_v38 = vmul.f32 %v1723_v13, %v2252_v29 }
  0xec   :  { %v1552_v31 = vadd.f32 %v1551_v1, %v1549_v0  ;;  %v1726_v39 = vmul.f32 %v2665_v14, %v1725_v15  ;;  %v2742_v0 = vrot.slane %v1377_v36, %v2232_v54 }
  0xed   :  { %v658_v47 = vpop.permute.xlu1 %657  ;;  %v683_v6 = vpop.permute.xlu0 %682 }
  0xee   :  { %v660_v18 = vsel %vm659_vm12, %v656_v27, %v658_v47  ;;  %v661_v22 = vsel %vm659_vm12, %v658_v47, %v656_v27  ;;  %v2728_v27 = vrot.slane %v1525_v56, %v2232_v54  ;;  %v2739_v56 = vrot.slane %v1700_v12, %v2232_v54 }
  0xef   :  { %v662_v63 = vmul.f32 %v661_v22, %v2546_v59  ;;  %v663_v30 = vmul.f32 %v660_v18, %v2549_v60  ;;  %1687 = vrot.lane.b32.xlu1 %v1682_v20, %s2171_s16  ;;  %1685 = vrot.lane.b32.xlu0 %v2639_v58, %s2171_s16  ;;  %v1575_v18 = vstv %s2679_s11  ;;  %v1577_v58 = vstv %s2687_s12 }
  0xf0   :  { %v2751_v12 = vrot.slane %v1552_v31, %v2232_v54  ;;  %v1727_v13 = vadd.f32 %v1726_v39, %v1724_v38  ;;  %v1576_v15 = vmul.f32 %v1575_v18, %v2252_v29  ;;  %v1709_v38 = vcombine.high %v2739_v56, %v2739_v56 }
  0xf1   :  { %v664_v45 = vadd.f32 %v662_v63, %v637_v17  ;;  %v665_v46 = vadd.f32 %v663_v30, %v638_v37  ;;  %v685_v47 = vpop.permute.xlu1 %684  ;;  %v710_v20 = vpop.permute.xlu0 %709  ;;  %v1750_v30 = vstv %s2710_s14  ;;  %v1386_v39 = vcombine.high %v2742_v0, %v2742_v0 }
  0xf2   :  { %v687_v22 = vsel %vm686_vm13, %v683_v6, %v685_v47  ;;  %v688_v62 = vsel %vm686_vm13, %v685_v47, %v683_v6  ;;  %v1752_v18 = vstv %s2717_s15  ;;  %vm1258_vm12 = vcmp.lt.s32.totalorder %v2478_v53, 114 }
  0xf3   :  { %v689_v1 = vmul.f32 %v688_v62, %v2566_v11  ;;  %v690_v63 = vmul.f32 %v687_v22, %v2579_v23  ;;  %1189 = vrot.lane.b32.xlu1 %v1184_v48, %s2172_s18  ;;  %1187 = vrot.lane.b32.xlu0 %v2650_v7, %s2172_s18  ;;  %v1578_v62 = vmul.f32 %v2665_v14, %v1577_v58  ;;  %v1777_v58 = vstv %s2725_s17 }
  0xf4   :  { %v1534_v7 = vcombine.high %v2728_v27, %v2728_v27  ;;  %v2775_v22 = vrot.slane %v1727_v13, %v2232_v54  ;;  %vm1285_vm13 = vcmp.lt.s32.totalorder %v2478_v53, 113 }
  0xf5   :  { %v691_v17 = vadd.f32 %v689_v1, %v664_v45  ;;  %v692_v36 = vadd.f32 %v690_v63, %v665_v46  ;;  %v712_v48 = vpop.permute.xlu1 %711  ;;  %v737_v37 = vpop.permute.xlu0 %736  ;;  %v1579_v1 = vadd.f32 %v1578_v62, %v1576_v15  ;;  %v2778_v63 = vmul.f32 %v1750_v30, %v2252_v29 }
  0xf6   :  { %v714_v47 = vsel %vm713_vm14, %v710_v20, %v712_v48  ;;  %v715_v31 = vsel %vm713_vm14, %v712_v48, %v710_v20  ;;  %v1561_v20 = vcombine.high %v2751_v12, %v2751_v12  ;;  %vm1435_vm14 = vcmp.lt.s32.totalorder %v2478_v53, 99 }
  0xf7   :  { %v716_v45 = vmul.f32 %v715_v31, %v2582_v24  ;;  %v717_v46 = vmul.f32 %v714_v47, %v2595_v28  ;;  %1364 = vrot.lane.b32.xlu1 %v1359_v10, %s2173_s19  ;;  %1362 = vrot.lane.b32.xlu0 %v2677_v2, %s2173_s19  ;;  %v407_v10 = vmul.f32 %v2546_v59, %v2509_v33 }
  0xf8   :  { %v408_v2 = vmul.f32 %v2549_v60, %v2507_v32 }
  0xf9   :  { %v718_v48 = vadd.f32 %v716_v45, %v691_v17  ;;  %v719_v47 = vadd.f32 %v717_v46, %v692_v36  ;;  %v739_v31 = vpop.permute.xlu1 %738  ;;  %v354_v6 = vpop.permute.xlu0 %353  ;;  %v446_v45 = vmul.f32 %v2579_v23, %v2533_v49 }
  0xfa   :  { %v741_v13 = vsel %vm740_vm15, %v737_v37, %v739_v31  ;;  %v742_v15 = vsel %vm740_vm15, %v739_v31, %v737_v37  ;;  %v358_v62 = vsel %vm357_vm0, %v2491_v21, %v354_v6  ;;  %v359_v33 = vsel %vm357_vm0, %v354_v6, %v2491_v21 }
  0xfb   :  { %v743_v32 = vmul.f32 %v742_v15, %v2602_v35  ;;  %v744_v17 = vmul.f32 %v741_v13, %v2609_v41  ;;  %v371_v36 = vmul.f32 %v2636_v57, %v359_v33  ;;  %v372_v30 = vmul.f32 %v2646_v5, %v358_v62  ;;  %1539 = vrot.lane.b32.xlu1 %v1534_v7, %s2174_s22 }
  0xfc   :  { %v445_v37 = vmul.f32 %v2566_v11, %v2537_v50  ;;  %1537 = vrot.lane.b32.xlu0 %v2728_v27, %s2174_s22  ;;  %v1753_v21 = vmul.f32 %v2665_v14, %v1752_v18  ;;  %v1778_v6 = vmul.f32 %v1777_v58, %v2252_v29  ;;  %v483_v33 = vmul.f32 %v2582_v24, %v2555_v4 }
  0xfd   :  { %v745_v46 = vadd.f32 %v743_v32, %v718_v48  ;;  %v746_v31 = vadd.f32 %v744_v17, %v719_v47  ;;  %v409_v13 = vadd.f32 %v407_v10, %v371_v36  ;;  %v410_v15 = vadd.f32 %v408_v2, %v372_v30  ;;  %v766_v62 = vpop.permute.xlu1 %765  ;;  %v764_v7 = vpop.permute.xlu0 %763 }
  0xfe   :  { %v484_v50 = vmul.f32 %v2595_v28, %v2553_v3  ;;  %v768_v49 = vsel %vm767_vm1, %v764_v7, %v766_v62  ;;  %v769_v27 = vsel %vm767_vm1, %v766_v62, %v764_v7  ;;  %v521_v4 = vmul.f32 %v2602_v35, %v2590_v26 }
  0xff   :  { %v447_v18 = vadd.f32 %v445_v37, %v409_v13  ;;  %v448_v58 = vadd.f32 %v446_v45, %v410_v15  ;;  %v770_v10 = vmul.f32 %v769_v27, %v2612_v44  ;;  %v771_v2 = vmul.f32 %v768_v49, %v2618_v51  ;;  %1714 = vrot.lane.b32.xlu1 %v1709_v38, %s2175_s23 }
 0x100   :  { %v522_v3 = vmul.f32 %v2609_v41, %v2586_v25  ;;  %1712 = vrot.lane.b32.xlu0 %v2739_v56, %s2175_s23  ;;  %v2824_v48 = vrot.slane %v1579_v1, %v2232_v54  ;;  %v1779_v47 = vstv %s2780_s20  ;;  %v559_v38 = vmul.f32 %v2612_v44, %v2626_v19 }
 0x101   :  { %v485_v32 = vadd.f32 %v483_v33, %v447_v18  ;;  %v486_v17 = vadd.f32 %v484_v50, %v448_v58  ;;  %v772_v36 = vadd.f32 %v770_v10, %v745_v46  ;;  %v773_v30 = vadd.f32 %v771_v2, %v746_v31  ;;  %v793_v37 = vpop.permute.xlu1 %792  ;;  %v791_v45 = vpop.permute.xlu0 %790 }
 0x102   :  { %v560_v26 = vmul.f32 %v2618_v51, %v2622_v40  ;;  %v795_v25 = vsel %vm794_vm2, %v791_v45, %v793_v37  ;;  %v796_v56 = vsel %vm794_vm2, %v793_v37, %v791_v45  ;;  %v597_v40 = vmul.f32 %v2629_v52, %v2660_v9 }
 0x103   :  { %v523_v1 = vadd.f32 %v521_v4, %v485_v32  ;;  %v524_v13 = vadd.f32 %v522_v3, %v486_v17  ;;  %v797_v15 = vmul.f32 %v796_v56, %v2629_v52  ;;  %v798_v46 = vmul.f32 %v795_v25, %v2633_v55  ;;  %1391 = vrot.lane.b32.xlu1 %v1386_v39, %s2176_s24 }
 0x104   :  { %v598_v19 = vmul.f32 %v2633_v55, %v2656_v8  ;;  %1389 = vrot.lane.b32.xlu0 %v2742_v0, %s2176_s24  ;;  %v1754_v31 = vadd.f32 %v1753_v21, %v2778_v63  ;;  %v1780_v62 = vmul.f32 %v2665_v14, %v1779_v47  ;;  %v1736_v0 = vcombine.high %v2775_v22, %v2775_v22 }
 0x105   :  { %v561_v7 = vadd.f32 %v559_v38, %v523_v1  ;;  %v562_v33 = vadd.f32 %v560_v26, %v524_v13  ;;  %v799_v50 = vadd.f32 %v797_v15, %v772_v36  ;;  %v800_v49 = vadd.f32 %v798_v46, %v773_v30  ;;  %v835_v27 = vpop.permute.xlu1 %834  ;;  %v833_v18 = vpop.permute.xlu0 %832 }
 0x106   :  { %v837_v39 = vsel %vm836_vm3, %v833_v18, %v835_v27  ;;  %v838_v9 = vsel %vm836_vm3, %v835_v27, %v833_v18  ;;  %v1588_v63 = vcombine.high %v2824_v48, %v2824_v48  ;;  %v1762_v21 = vrot.slane %v1754_v31, %v2232_v54 }
 0x107   :  { %v599_v58 = vadd.f32 %v597_v40, %v561_v7  ;;  %v600_v8 = vadd.f32 %v598_v19, %v562_v33  ;;  %1566 = vrot.lane.b32.xlu1 %v1561_v20, %s2177_s25  ;;  %v1781_v10 = vadd.f32 %v1780_v62, %v1778_v6  ;;  %v3063_v20 = vrot.slane %v2668_v16, %v2525_v43 }
 0x108   :  { %1564 = vrot.lane.b32.xlu0 %v2751_v12, %s2177_s25  ;;  %v3064_v3 = vrot.slane %v2683_v34, %v2522_v42  ;;  %v3065_v47 = vrot.slane %v2683_v34, %v2525_v43  ;;  %v839_v6 = vmul.f32 %v838_v9, %v2636_v57  ;;  %v840_v30 = vmul.f32 %v837_v39, %v2646_v5 }
 0x109   :  { %v612_v2 = vmul.f32 %v605_v61, %v599_v58  ;;  %v613_v4 = vmul.f32 %v3063_v20, %v600_v8  ;;  %v860_v17 = vpop.permute.xlu1 %859  ;;  %v858_v36 = vpop.permute.xlu0 %857  ;;  %v1763_v19 = vcombine.high %v1762_v21, %v1762_v21  ;;  %vm1460_vm15 = vcmp.lt.s32.totalorder %v2478_v53, 98 }
 0x10a   :  { %v812_v12 = vmul.f32 %v3064_v3, %v799_v50  ;;  %v813_v32 = vmul.f32 %v3065_v47, %v800_v49  ;;  %v862_v61 = vsel %vm861_vm4, %v858_v36, %v860_v17  ;;  %v863_v16 = vsel %vm861_vm4, %v860_v17, %v858_v36 }
 0x10b   :  { %v864_v38 = vmul.f32 %v863_v16, %v2546_v59  ;;  %v865_v34 = vmul.f32 %v862_v61, %v2549_v60  ;;  %1741 = vrot.lane.b32.xlu1 %v1736_v0, %s2178_s26  ;;  %vm969_vm0 = vcmp.lt.s32.totalorder %v2478_v53, 14  ;;  %vm1137_vm1 = vcmp.lt.s32.totalorder %v2478_v53, 127 }
 0x10c   :  { %v2880_v37 = vadd.f32 %v812_v12, %v612_v2  ;;  %v2882_v45 = vadd.f32 %v813_v32, %v613_v4  ;;  %1739 = vrot.lane.b32.xlu0 %v2775_v22, %s2178_s26  ;;  %v1789_v22 = vrot.slane %v1781_v10, %v2232_v54  ;;  %vm1312_vm2 = vcmp.lt.s32.totalorder %v2478_v53, 112 }
 0x10d   :  { %v866_v26 = vadd.f32 %v864_v38, %v839_v6  ;;  %v867_v25 = vadd.f32 %v865_v34, %v840_v30  ;;  %v887_v56 = vpop.permute.xlu1 %886  ;;  %v885_v1 = vpop.permute.xlu0 %884  ;;  %vm1487_vm3 = vcmp.lt.s32.totalorder %v2478_v53, 97  ;;  %vm996_vm4 = vcmp.lt.s32.totalorder %v2478_v53, 13 }
 0x10e   :  { %v889_v13 = vsel %vm888_vm5, %v885_v1, %v887_v56  ;;  %v890_v15 = vsel %vm888_vm5, %v887_v56, %v885_v1  ;;  %v1790_v39 = vcombine.high %v1789_v22, %v1789_v22  ;;  %vm1164_vm5 = vcmp.lt.s32.totalorder %v2478_v53, 126 }
 0x10f   :  { %v891_v46 = vmul.f32 %v890_v15, %v2566_v11  ;;  %v892_v40 = vmul.f32 %v889_v13, %v2579_v23  ;;  %1593 = vrot.lane.b32.xlu1 %v1588_v63, %s2179_s27  ;;  %v1097_v15 = vstv %s1883_s29 }
 0x110   :  { %1591 = vrot.lane.b32.xlu0 %v2824_v48, %s2179_s27 }
 0x111   :  { %v893_v31 = vadd.f32 %v891_v46, %v866_v26  ;;  %v894_v62 = vadd.f32 %v892_v40, %v867_v25  ;;  %v914_v7 = vpop.permute.xlu1 %913  ;;  %v912_v33 = vpop.permute.xlu0 %911 }
 0x112   :  { %v916_v50 = vsel %vm915_vm6, %v912_v33, %v914_v7  ;;  %v917_v49 = vsel %vm915_vm6, %v914_v7, %v912_v33  ;;  %vm1339_vm6 = vcmp.lt.s32.totalorder %v2478_v53, 111 }
 0x113   :  { %v918_v27 = vmul.f32 %v917_v49, %v2582_v24  ;;  %v919_v18 = vmul.f32 %v916_v50, %v2595_v28  ;;  %1768 = vrot.lane.b32.xlu1 %v1763_v19, %s2180_s21  ;;  %v1099_v19 = vstv %s1932_s2 }
 0x114   :  { %1766 = vrot.lane.b32.xlu0 %v1762_v21, %s2180_s21  ;;  %v1100_v50 = vmul.f32 %v2665_v14, %v1099_v19 }
 0x115   :  { %v920_v9 = vadd.f32 %v918_v27, %v893_v31  ;;  %v921_v58 = vadd.f32 %v919_v18, %v894_v62  ;;  %v1035_v8 = vpop.permute.xlu1 %1034  ;;  %v939_v0 = vpop.permute.xlu0 %938 }
 0x117   :  { %1795 = vrot.lane.b32.xlu1 %v1790_v39, %s2181_s28 }
 0x118   :  { %1793 = vrot.lane.b32.xlu0 %v1789_v22, %s2181_s28  ;;  %v1098_v22 = vmul.f32 %v1097_v15, %v2252_v29 }
 0x119   :  { %v1060_v48 = vpop.permute.xlu1 %1059  ;;  %v1037_v63 = vpop.permute.xlu0 %1036 }
 0x11a   :  { %v1039_v10 = vsel %vm1038_vm7, %v1035_v8, %v1037_v63  ;;  %v1040_v2 = vsel %vm1038_vm7, %v1037_v63, %v1035_v8  ;;  %vm1514_vm7 = vcmp.lt.s32.totalorder %v2478_v53, 96 }
 0x11b   :  { %v1041_v12 = vmul.f32 %v1040_v2, %v2636_v57  ;;  %v1042_v47 = vmul.f32 %v1039_v10, %v2646_v5 }
 0x11d   :  { %v1087_v20 = vpop.permute.xlu1 %1086  ;;  %v1062_v4 = vpop.permute.xlu0 %1061 }
 0x11e   :  { %v1064_v3 = vsel %vm1063_vm8, %v1060_v48, %v1062_v4  ;;  %v1065_v21 = vsel %vm1063_vm8, %v1062_v4, %v1060_v48  ;;  %vm1191_vm8 = vcmp.lt.s32.totalorder %v2478_v53, 125 }
 0x11f   :  { %v1066_v32 = vmul.f32 %v1065_v21, %v2546_v59  ;;  %v1067_v17 = vmul.f32 %v1064_v3, %v2549_v60 }
 0x121   :  { %v1068_v36 = vadd.f32 %v1066_v32, %v1041_v12  ;;  %v1069_v6 = vadd.f32 %v1067_v17, %v1042_v47  ;;  %v1230_v30 = vpop.permute.xlu1 %1229  ;;  %v1089_v61 = vpop.permute.xlu0 %1088  ;;  %v1101_v12 = vadd.f32 %v1100_v50, %v1098_v22 }
 0x122   :  { %v1091_v16 = vsel %vm1090_vm9, %v1087_v20, %v1089_v61  ;;  %v1092_v38 = vsel %vm1090_vm9, %v1089_v61, %v1087_v20  ;;  %vm1366_vm9 = vcmp.lt.s32.totalorder %v2478_v53, 110 }
 0x123   :  { %v1093_v34 = vmul.f32 %v1092_v38, %v2566_v11  ;;  %v1094_v26 = vmul.f32 %v1091_v16, %v2579_v23  ;;  %v1109_v61 = vrot.slane %v1101_v12, %v2232_v54 }
 0x125   :  { %v2908_v25 = vadd.f32 %v1093_v34, %v1068_v36  ;;  %v2910_v56 = vadd.f32 %v1094_v26, %v1069_v6  ;;  %v1255_v1 = vpop.permute.xlu1 %1254  ;;  %v1232_v13 = vpop.permute.xlu0 %1231 }
 0x126   :  { %v1234_v46 = vsel %vm1233_vm10, %v1230_v30, %v1232_v13  ;;  %v1235_v40 = vsel %vm1233_vm10, %v1232_v13, %v1230_v30  ;;  %vm1541_vm10 = vcmp.lt.s32.totalorder %v2478_v53, 95 }
 0x127   :  { %v1236_v31 = vmul.f32 %v1234_v46, %v2636_v57  ;;  %v1237_v62 = vmul.f32 %v1235_v40, %v2646_v5 }
 0x129   :  { %v941_v7 = vpop.permute.xlu1 %940  ;;  %v1257_v33 = vpop.permute.xlu0 %1256 }
 0x12a   :  { %v943_v49 = vsel %vm942_vm11, %v939_v0, %v941_v7  ;;  %v944_v27 = vsel %vm942_vm11, %v941_v7, %v939_v0  ;;  %v1259_v18 = vsel %vm1258_vm12, %v1255_v1, %v1257_v33  ;;  %v1260_v39 = vsel %vm1258_vm12, %v1257_v33, %v1255_v1 }
 0x12b   :  { %v945_v8 = vmul.f32 %v944_v27, %v2602_v35  ;;  %v946_v48 = vmul.f32 %v943_v49, %v2609_v41  ;;  %v1261_v29 = vmul.f32 %v1259_v18, %v2546_v59  ;;  %v1262_v63 = vmul.f32 %v1260_v39, %v2549_v60 }
 0x12c   :  { %v1110_v1 = vcombine.high %v1109_v61, %v1109_v61  ;;  %v1113_v33 = vmul.f32 %v1109_v61, %v2582_v24  ;;  %vm1393_vm11 = vcmp.lt.s32.totalorder %v2478_v53, 109  ;;  %vm1637_vm12 = vcmp.lt.s32.totalorder %v2478_v53, 83 }
 0x12d   :  { %v947_v10 = vadd.f32 %v945_v8, %v920_v9  ;;  %v948_v2 = vadd.f32 %v946_v48, %v921_v58  ;;  %v1263_v20 = vadd.f32 %v1261_v29, %v1236_v31  ;;  %v1264_v4 = vadd.f32 %v1262_v63, %v1237_v62  ;;  %v1284_v3 = vpop.permute.xlu1 %1283  ;;  %v1282_v21 = vpop.permute.xlu0 %1281 }
 0x12e   :  { %v1286_v14 = vsel %vm1285_vm13, %v1282_v21, %v1284_v3  ;;  %v1287_v0 = vsel %vm1285_vm13, %v1284_v3, %v1282_v21  ;;  %v1114_v27 = vmul.f32 %v1110_v1, %v2595_v28  ;;  %vm1662_vm13 = vcmp.lt.s32.totalorder %v2478_v53, 82 }
 0x12f   :  { %v1288_v47 = vmul.f32 %v1286_v14, %v2566_v11  ;;  %v1289_v32 = vmul.f32 %v1287_v0, %v2579_v23 }
 0x131   :  { %v1290_v17 = vadd.f32 %v1288_v47, %v1263_v20  ;;  %v1291_v9 = vadd.f32 %v1289_v32, %v1264_v4  ;;  %v1434_v58 = vpop.permute.xlu1 %1433  ;;  %v1432_v36 = vpop.permute.xlu0 %1431  ;;  %v1115_v20 = vadd.f32 %v1113_v33, %v2908_v25  ;;  %v1116_v4 = vadd.f32 %v1114_v27, %v2910_v56 }
 0x132   :  { %v1436_v6 = vsel %vm1435_vm14, %v1432_v36, %v1434_v58  ;;  %v1437_v30 = vsel %vm1435_vm14, %v1434_v58, %v1432_v36  ;;  %vm1568_vm14 = vcmp.lt.s32.totalorder %v2478_v53, 94 }
 0x133   :  { %v1438_v13 = vmul.f32 %v1436_v6, %v2636_v57  ;;  %v1439_v15 = vmul.f32 %v1437_v30, %v2646_v5 }
 0x135   :  { %v1459_v16 = vpop.permute.xlu1 %1458  ;;  %v1457_v38 = vpop.permute.xlu0 %1456 }
 0x136   :  { %v1461_v34 = vsel %vm1460_vm15, %v1457_v38, %v1459_v16  ;;  %v1462_v26 = vsel %vm1460_vm15, %v1459_v16, %v1457_v38  ;;  %vm1689_vm15 = vcmp.lt.s32.totalorder %v2478_v53, 81 }
 0x137   :  { %v1463_v46 = vmul.f32 %v1461_v34, %v2546_v59  ;;  %v1464_v40 = vmul.f32 %v1462_v26, %v2549_v60 }
 0x139   :  { %v1465_v19 = vadd.f32 %v1463_v46, %v1438_v13  ;;  %v1466_v22 = vadd.f32 %v1464_v40, %v1439_v15  ;;  %v968_v54 = vpop.permute.xlu1 %967  ;;  %v966_v31 = vpop.permute.xlu0 %965 }
 0x13a   :  { %v970_v62 = vsel %vm969_vm0, %v966_v31, %v968_v54  ;;  %v971_v7 = vsel %vm969_vm0, %v968_v54, %v966_v31  ;;  %vm1716_vm0 = vcmp.lt.s32.totalorder %v2478_v53, 80 }
 0x13b   :  { %v972_v50 = vmul.f32 %v971_v7, %v2612_v44  ;;  %v973_v49 = vmul.f32 %v970_v62, %v2618_v51 }
 0x13d   :  { %v974_v18 = vadd.f32 %v972_v50, %v947_v10  ;;  %v975_v39 = vadd.f32 %v973_v49, %v948_v2  ;;  %v1136_v8 = vpop.permute.xlu1 %1135  ;;  %v1134_v48 = vpop.permute.xlu0 %1133 }
 0x13e   :  { %v1138_v29 = vsel %vm1137_vm1, %v1134_v48, %v1136_v8  ;;  %v1139_v63 = vsel %vm1137_vm1, %v1136_v8, %v1134_v48  ;;  %vm1743_vm1 = vcmp.lt.s32.totalorder %v2478_v53, 79 }
 0x13f   :  { %v1140_v3 = vmul.f32 %v1138_v29, %v2602_v35  ;;  %v1141_v21 = vmul.f32 %v1139_v63, %v2609_v41 }
 0x141   :  { %v1142_v14 = vadd.f32 %v1140_v3, %v1115_v20  ;;  %v1143_v0 = vadd.f32 %v1141_v21, %v1116_v4  ;;  %v1311_v12 = vpop.permute.xlu1 %1310  ;;  %v1309_v47 = vpop.permute.xlu0 %1308 }
 0x142   :  { %v1313_v10 = vsel %vm1312_vm2, %v1309_v47, %v1311_v12  ;;  %v1314_v2 = vsel %vm1312_vm2, %v1311_v12, %v1309_v47  ;;  %vm1595_vm2 = vcmp.lt.s32.totalorder %v2478_v53, 93 }
 0x143   :  { %v1315_v32 = vmul.f32 %v1313_v10, %v2582_v24  ;;  %v1316_v58 = vmul.f32 %v1314_v2, %v2595_v28 }
 0x145   :  { %v1317_v36 = vadd.f32 %v1315_v32, %v1290_v17  ;;  %v1318_v25 = vadd.f32 %v1316_v58, %v1291_v9  ;;  %v1486_v6 = vpop.permute.xlu1 %1485  ;;  %v1484_v56 = vpop.permute.xlu0 %1483  ;;  %v313_v17 = vld [vmem:[#allocation8 + $0x2] ss:$8 sm:$0x3] }
 0x146   :  { %v1488_v30 = vsel %vm1487_vm3, %v1484_v56, %v1486_v6  ;;  %v1489_v61 = vsel %vm1487_vm3, %v1486_v6, %v1484_v56  ;;  %v1007_v54 = vrot.slane %v313_v17, %v2522_v42  ;;  %vm1770_vm3 = vcmp.lt.s32.totalorder %v2478_v53, 78 }
 0x147   :  { %v1490_v16 = vmul.f32 %v1488_v30, %v2566_v11  ;;  %v1491_v38 = vmul.f32 %v1489_v61, %v2579_v23 }
 0x149   :  { %v1492_v34 = vadd.f32 %v1490_v16, %v1465_v19  ;;  %v1493_v26 = vadd.f32 %v1491_v38, %v1466_v22  ;;  %v2952_v1 = vpop.permute.xlu1 %1635  ;;  %v2954_v13 = vpop.permute.xlu0 %1633  ;;  %v1011_v19 = vrot.slane %v313_v17, %v2525_v43 }
 0x14d   :  { %v2956_v15 = vpop.permute.xlu1 %1660  ;;  %v2958_v46 = vpop.permute.xlu0 %1658 }
 0x151   :  { %v995_v9 = vpop.permute.xlu1 %994  ;;  %v993_v40 = vpop.permute.xlu0 %992 }
 0x152   :  { %v997_v31 = vsel %vm996_vm4, %v993_v40, %v995_v9  ;;  %v998_v62 = vsel %vm996_vm4, %v995_v9, %v993_v40  ;;  %v315_v40 = vld [vmem:[#allocation8 + $0x3] ss:$8 sm:$0x3]  ;;  %vm1797_vm4 = vcmp.lt.s32.totalorder %v2478_v53, 77 }
 0x153   :  { %v999_v22 = vmul.f32 %v998_v62, %v2629_v52  ;;  %v1000_v7 = vmul.f32 %v997_v31, %v2633_v55 }
 0x155   :  { %v1001_v33 = vadd.f32 %v999_v22, %v974_v18  ;;  %v1002_v50 = vadd.f32 %v1000_v7, %v975_v39  ;;  %v1163_v49 = vpop.permute.xlu1 %1162  ;;  %v1161_v27 = vpop.permute.xlu0 %1160 }
 0x156   :  { %v1165_v8 = vsel %vm1164_vm5, %v1161_v27, %v1163_v49  ;;  %v1166_v48 = vsel %vm1164_vm5, %v1163_v49, %v1161_v27 }
 0x157   :  { %v1014_v29 = vmul.f32 %v1007_v54, %v1001_v33  ;;  %v1015_v63 = vmul.f32 %v1011_v19, %v1002_v50  ;;  %v1167_v20 = vmul.f32 %v1165_v8, %v2612_v44  ;;  %v1168_v4 = vmul.f32 %v1166_v48, %v2618_v51 }
 0x158   :  { %v1206_v19 = vrot.slane %v315_v40, %v2525_v43 }
 0x159   :  { %v1016_v3 = vadd.f32 %v1014_v29, %v2880_v37  ;;  %v1017_v21 = vadd.f32 %v1015_v63, %v2882_v45  ;;  %v1169_v12 = vadd.f32 %v1167_v20, %v1142_v14  ;;  %v1170_v47 = vadd.f32 %v1168_v4, %v1143_v0  ;;  %v1338_v18 = vpop.permute.xlu1 %1337  ;;  %v1336_v39 = vpop.permute.xlu0 %1335 }
 0x15a   :  { %v1340_v10 = vsel %vm1339_vm6, %v1336_v39, %v1338_v18  ;;  %v1341_v2 = vsel %vm1339_vm6, %v1338_v18, %v1336_v39 }
 0x15b   :  { %v1342_v32 = vmul.f32 %v1340_v10, %v2602_v35  ;;  %v1343_v58 = vmul.f32 %v1341_v2, %v2609_v41 }
 0x15d   :  { %v1344_v6 = vadd.f32 %v1342_v32, %v1317_v36  ;;  %v1345_v56 = vadd.f32 %v1343_v58, %v1318_v25  ;;  %v1513_v30 = vpop.permute.xlu1 %1512  ;;  %v1511_v61 = vpop.permute.xlu0 %1510  ;;  %v1202_v25 = vrot.slane %v315_v40, %v2522_v42 }
 0x15e   :  { %v1515_v16 = vsel %vm1514_vm7, %v1511_v61, %v1513_v30  ;;  %v1516_v37 = vsel %vm1514_vm7, %v1513_v30, %v1511_v61 }
 0x15f   :  { %v1517_v45 = vmul.f32 %v1515_v16, %v2582_v24  ;;  %v1518_v14 = vmul.f32 %v1516_v37, %v2595_v28 }
 0x161   :  { %v1519_v0 = vadd.f32 %v1517_v45, %v1492_v34  ;;  %v1520_v38 = vadd.f32 %v1518_v14, %v1493_v26  ;;  %v2976_v17 = vpop.permute.xlu1 %1687  ;;  %v2978_v9 = vpop.permute.xlu0 %1685  ;;  %v317_v45 = vld [vmem:[#allocation8 + $0x4] ss:$8 sm:$0x3] }
 0x162   :  { %v1408_v40 = vrot.slane %v317_v45, %v2525_v43 }
 0x165   :  { %v1190_v54 = vpop.permute.xlu1 %1189  ;;  %v1188_v36 = vpop.permute.xlu0 %1187 }
 0x166   :  { %v1192_v31 = vsel %vm1191_vm8, %v1188_v36, %v1190_v54  ;;  %v1193_v62 = vsel %vm1191_vm8, %v1190_v54, %v1188_v36  ;;  %v1663_v36 = vsel %vm1662_vm13, %v2958_v46, %v2956_v15 }
 0x167   :  { %v1194_v22 = vmul.f32 %v1192_v31, %v2629_v52  ;;  %v1195_v34 = vmul.f32 %v1193_v62, %v2633_v55 }
 0x169   :  { %v1196_v26 = vadd.f32 %v1194_v22, %v1169_v12  ;;  %v1197_v7 = vadd.f32 %v1195_v34, %v1170_v47  ;;  %v1365_v33 = vpop.permute.xlu1 %1364  ;;  %v1363_v50 = vpop.permute.xlu0 %1362  ;;  %v1638_v22 = vsel %vm1637_vm12, %v2954_v13, %v2952_v1  ;;  %v1639_v34 = vsel %vm1637_vm12, %v2952_v1, %v2954_v13 }
 0x16a   :  { %v1367_v49 = vsel %vm1366_vm9, %v1363_v50, %v1365_v33  ;;  %v1368_v27 = vsel %vm1366_vm9, %v1365_v33, %v1363_v50  ;;  %v1691_v1 = vsel %vm1689_vm15, %v2976_v17, %v2978_v9 }
 0x16b   :  { %v1209_v8 = vmul.f32 %v1202_v25, %v1196_v26  ;;  %v1210_v48 = vmul.f32 %v1206_v19, %v1197_v7  ;;  %v1369_v29 = vmul.f32 %v1367_v49, %v2612_v44  ;;  %v1370_v63 = vmul.f32 %v1368_v27, %v2618_v51 }
 0x16c   :  { %v1664_v25 = vsel %vm1662_vm13, %v2956_v15, %v2958_v46  ;;  %v1665_v46 = vmul.f32 %v1663_v36, %v2546_v59 }
 0x16d   :  { %v1211_v20 = vadd.f32 %v1209_v8, %v1016_v3  ;;  %v1212_v4 = vadd.f32 %v1210_v48, %v1017_v21  ;;  %v1371_v18 = vadd.f32 %v1369_v29, %v1344_v6  ;;  %v1372_v39 = vadd.f32 %v1370_v63, %v1345_v56  ;;  %v1540_v10 = vpop.permute.xlu1 %1539 }
 0x16e   :  { %v1538_v2 = vpop.permute.xlu0 %1537  ;;  %v1404_v21 = vrot.slane %v317_v45, %v2522_v42  ;;  %v1666_v27 = vmul.f32 %v1664_v25, %v2549_v60  ;;  %v1690_v8 = vsel %vm1689_vm15, %v2978_v9, %v2976_v17  ;;  %v1693_v9 = vmul.f32 %v1691_v1, %v2579_v23 }
 0x16f   :  { %v1542_v12 = vsel %vm1541_vm10, %v1538_v2, %v1540_v10  ;;  %v1543_v47 = vsel %vm1541_vm10, %v1540_v10, %v1538_v2  ;;  %v319_v10 = vld [vmem:[#allocation8 + $0x5] ss:$8 sm:$0x3]  ;;  %v1640_v2 = vmul.f32 %v1638_v22, %v2636_v57  ;;  %v1692_v17 = vmul.f32 %v1690_v8, %v2566_v11  ;;  %v321_v22 = vld [vmem:[#allocation8 + $0x6] ss:$8 sm:$0x3] }
 0x170   :  { %v1544_v32 = vmul.f32 %v1542_v12, %v2602_v35  ;;  %v1545_v58 = vmul.f32 %v1543_v47, %v2609_v41  ;;  %v1641_v12 = vmul.f32 %v1639_v34, %v2646_v5  ;;  %v1610_v45 = vrot.slane %v319_v10, %v2525_v43 }
 0x171   :  { %v1715_v30 = vpop.permute.xlu1 %1714  ;;  %v1667_v47 = vadd.f32 %v1665_v46, %v1640_v2 }
 0x172   :  { %v1546_v61 = vadd.f32 %v1544_v32, %v1519_v0  ;;  %v1547_v16 = vadd.f32 %v1545_v58, %v1520_v38  ;;  %v1713_v37 = vpop.permute.xlu0 %1712  ;;  %v1668_v32 = vadd.f32 %v1666_v27, %v1641_v12 }
 0x173   :  { %v1717_v59 = vsel %vm1716_vm0, %v1713_v37, %v1715_v30  ;;  %v1718_v60 = vsel %vm1716_vm0, %v1715_v30, %v1713_v37 }
 0x174   :  { %v1719_v58 = vmul.f32 %v1717_v59, %v2582_v24  ;;  %v1720_v30 = vmul.f32 %v1718_v60, %v2595_v28 }
 0x175   :  { %v1392_v14 = vpop.permute.xlu1 %1391 }
 0x176   :  { %v1390_v3 = vpop.permute.xlu0 %1389 }
 0x177   :  { %v1394_v6 = vsel %vm1393_vm11, %v1390_v3, %v1392_v14  ;;  %v1395_v56 = vsel %vm1393_vm11, %v1392_v14, %v1390_v3  ;;  %v1694_v14 = vadd.f32 %v1692_v17, %v1667_v47  ;;  %v1695_v3 = vadd.f32 %v1693_v9, %v1668_v32 }
 0x178   :  { %v1396_v54 = vmul.f32 %v1394_v6, %v2629_v52  ;;  %v1397_v0 = vmul.f32 %v1395_v56, %v2633_v55 }
 0x179   :  { %v1567_v38 = vpop.permute.xlu1 %1566 }
 0x17a   :  { %v1398_v31 = vadd.f32 %v1396_v54, %v1371_v18  ;;  %v1399_v62 = vadd.f32 %v1397_v0, %v1372_v39  ;;  %v1565_v19 = vpop.permute.xlu0 %1564  ;;  %v1721_v54 = vadd.f32 %v1719_v58, %v1694_v14  ;;  %v1722_v0 = vadd.f32 %v1720_v30, %v1695_v3 }
 0x17b   :  { %v1569_v26 = vsel %vm1568_vm14, %v1565_v19, %v1567_v38  ;;  %v1570_v7 = vsel %vm1568_vm14, %v1567_v38, %v1565_v19 }
 0x17c   :  { %v1411_v33 = vmul.f32 %v1404_v21, %v1398_v31  ;;  %v1412_v50 = vmul.f32 %v1408_v40, %v1399_v62  ;;  %v1571_v49 = vmul.f32 %v1569_v26, %v2612_v44  ;;  %v1572_v15 = vmul.f32 %v1570_v7, %v2618_v51 }
 0x17d   :  { %v1742_v13 = vpop.permute.xlu1 %1741 }
 0x17e   :  { %v1413_v48 = vadd.f32 %v1411_v33, %v1211_v20  ;;  %v1414_v29 = vadd.f32 %v1412_v50, %v1212_v4  ;;  %v1573_v63 = vadd.f32 %v1571_v49, %v1546_v61  ;;  %v1574_v18 = vadd.f32 %v1572_v15, %v1547_v16  ;;  %v1740_v39 = vpop.permute.xlu0 %1739 }
 0x17f   :  { %v1606_v4 = vrot.slane %v319_v10, %v2522_v42  ;;  %v1744_v61 = vsel %vm1743_vm1, %v1740_v39, %v1742_v13  ;;  %v1745_v5 = vsel %vm1743_vm1, %v1742_v13, %v1740_v39  ;;  %v1808_v50 = vrot.slane %v321_v22, %v2522_v42 }
 0x180   :  { %v1746_v24 = vmul.f32 %v1744_v61, %v2602_v35  ;;  %v1747_v28 = vmul.f32 %v1745_v5, %v2609_v41  ;;  %v1812_v49 = vrot.slane %v321_v22, %v2525_v43 }
 0x181   :  { %v1594_v20 = vpop.permute.xlu1 %1593 }
 0x182   :  { %v1592_v57 = vpop.permute.xlu0 %1591  ;;  %v1748_v26 = vadd.f32 %v1746_v24, %v1721_v54  ;;  %v1749_v7 = vadd.f32 %v1747_v28, %v1722_v0 }
 0x183   :  { %v1596_v16 = vsel %vm1595_vm2, %v1592_v57, %v1594_v20  ;;  %v1597_v37 = vsel %vm1595_vm2, %v1594_v20, %v1592_v57 }
 0x184   :  { %v1598_v11 = vmul.f32 %v1596_v16, %v2629_v52  ;;  %v1599_v23 = vmul.f32 %v1597_v37, %v2633_v55 }
 0x185   :  { %v1769_v21 = vpop.permute.xlu1 %1768 }
 0x186   :  { %v1600_v6 = vadd.f32 %v1598_v11, %v1573_v63  ;;  %v1601_v56 = vadd.f32 %v1599_v23, %v1574_v18  ;;  %v1767_v40 = vpop.permute.xlu0 %1766 }
 0x187   :  { %v1771_v38 = vsel %vm1770_vm3, %v1767_v40, %v1769_v21  ;;  %v1772_v36 = vsel %vm1770_vm3, %v1769_v21, %v1767_v40 }
 0x188   :  { %v1613_v25 = vmul.f32 %v1606_v4, %v1600_v6  ;;  %v1614_v31 = vmul.f32 %v1610_v45, %v1601_v56  ;;  %v1773_v62 = vmul.f32 %v1771_v38, %v2612_v44  ;;  %v1774_v19 = vmul.f32 %v1772_v36, %v2618_v51 }
 0x189   :  { %v1796_v34 = vpop.permute.xlu1 %1795 }
 0x18a   :  { %v1615_v35 = vadd.f32 %v1613_v25, %v1413_v48  ;;  %v1616_v33 = vadd.f32 %v1614_v31, %v1414_v29  ;;  %v1794_v41 = vpop.permute.xlu0 %1793  ;;  %v1775_v44 = vadd.f32 %v1773_v62, %v1748_v26  ;;  %v1776_v27 = vadd.f32 %v1774_v19, %v1749_v7 }
 0x18b   :  { %v1798_v15 = vsel %vm1797_vm4, %v1794_v41, %v1796_v34  ;;  %v1799_v46 = vsel %vm1797_vm4, %v1796_v34, %v1794_v41 }
 0x18c   :  { %v1800_v51 = vmul.f32 %v1798_v15, %v2629_v52  ;;  %v1801_v8 = vmul.f32 %v1799_v46, %v2633_v55 }
 0x18e   :  { %v1802_v1 = vadd.f32 %v1800_v51, %v1775_v44  ;;  %v1803_v13 = vadd.f32 %v1801_v8, %v1776_v27 }
 0x190   :  { %v1815_v48 = vmul.f32 %v1808_v50, %v1802_v1  ;;  %v1816_v29 = vmul.f32 %v1812_v49, %v1803_v13 }
 0x192   :  { %v1817_v63 = vadd.f32 %v1815_v48, %v1615_v35  ;;  %v1818_v42 = vadd.f32 %v1816_v29, %v1616_v33 }
 0x194   :  { %v1957_v18 = vmul.f32 -1.442695, %v1817_v63  ;;  %v1958_v43 = vmul.f32 -1.442695, %v1818_v42 }
 0x196   :  { %2020 = vpow2.f32 %v1957_v18 }
 0x197   :  { %2022 = vpow2.f32 %v1958_v43 }
 0x1a3   :  { %v2021_v39 = vpop.eup %2020 }
 0x1a4   :  { %v2023_v10 = vpop.eup %2022  ;;  %v1825_v53 = vadd.f32 1.0, %v2021_v39 }
 0x1a5   :  { %v1826_v59 = vadd.f32 1.0, %v2023_v10 }
 0x1a6   :  { %2024 = vrcp.f32 %v1825_v53 }
 0x1a7   :  { %2026 = vrcp.f32 %v1826_v59 }
 0x1b3   :  { %v2025_v52 = vpop.eup %2024 }
 0x1b4   :  { %v2027_v55 = vpop.eup %2026 }
 0x1b5   :  { %v1833_v60 = vcombine.low %v2025_v52, %v2027_v55 }
 0x1b7   :  { %1959 = vst.sshfl [vmem:[#allocation12] sm:$0x33 pattern:$0x76325410] %v1833_v60 }
 0x1b8   :  { %2108 = shalt.err (!%p2105_p5)
}
 0x1b9   :  { %1852 = dma.vmem_to_hbm [thread:$0]  %s1850_s30, 64, %s3062_s4, [#allocation6]  }
 0x1ba   :  { %2123 = dma.done.wait [#allocation6], 64  }
 0x1bb   :  { %2124 = vsyncadd [#allocation6], 4294967232 }
 0x1bc   :  { %1856 = vsyncpa [#allocation5], 1 }
 0x1bd   :  { %1857 = vsyncpa [#allocation10], 1 }
 0x1be   :  { %1858 = vsyncpa [#allocation6], 1 }
 0x1bf   :  { %1859 = vsyncpa [#allocation7], 1 }

</bundles_post_ra>
